<compile_context>
chip_gen: v7x
topology: tpu7x:2x2x1
jax: 0.10.0
libtpu: 0.0.40
codegen_flags: <defaults>
</compile_context>

<pallas_src>
import jax
import jax.numpy as jnp
from jax import lax
from jax.experimental import pallas as pl
from jax.experimental.pallas import tpu as pltpu
import numpy as np


def _round_up(x, m):
    return (x + m - 1) // m * m


# ----------------------------- Pallas kernel ------------------------------- #

def _bottleneck_kernel(x_ref, w1_ref, w2_ref, w3_ref, b1_ref, b2_ref, b3_ref,
                       o_ref, h1p_ref):
    """Fused Bottleneck forward for one batch image (NHWC, channel-padded).

    x_ref  : (1, H, W, CP)   input image, channels zero-padded to CP
    w1_ref : (CP, WP)        conv1 1x1 weights, BN1 scale folded, bf16
    w2_ref : (9, WP, WP)     conv2 3x3 weights (tap index = kh*3+kw), BN2 folded, bf16
    w3_ref : (WP, CP)        conv3 1x1 weights, BN3 scale folded, bf16
    b1_ref : (1, WP) f32     folded BN1 bias
    b2_ref : (1, WP) f32     folded BN2 bias
    b3_ref : (1, CP) f32     folded BN3 bias
    o_ref  : (1, H, W, CP)   output
    h1p_ref: (H+2, W+2, WP)  f32 scratch: conv1 output with a zero spatial halo
    """
    _, H, W, CP = x_ref.shape
    WP = w1_ref.shape[1]

    x = x_ref[0]                                    # (H, W, CP)
    x2d = x.reshape(H * W, CP)

    # --- conv1 (1x1) + BN1 + ReLU: bf16 MXU matmul, f32 accumulate ----------
    a1 = jnp.dot(x2d.astype(jnp.bfloat16), w1_ref[...],
                 preferred_element_type=jnp.float32)
    h1 = jnp.maximum(a1 + b1_ref[...], 0.0)         # (H*W, WP) f32

    # Place conv1 output into a zero-padded scratch so the 3x3 conv sees a
    # zero halo (PyTorch padding=1 semantics: the *conv2 input* is zero-padded).
    h1p_ref[...] = jnp.zeros_like(h1p_ref)
    h1p_ref[1:H + 1, 1:W + 1, :] = h1.reshape(H, W, WP)

    # --- conv2 (3x3, pad=1) + BN2 + ReLU: 9 shifted MXU matmuls -------------
    # In-kernel "im2col": no 9x patch expansion ever touches HBM.
    acc2 = jnp.zeros((H * W, WP), jnp.float32)
    for kh in range(3):
        for kw in range(3):
            tap = h1p_ref[kh:kh + H, kw:kw + W, :].reshape(H * W, WP)
            acc2 = acc2 + jnp.dot(tap.astype(jnp.bfloat16),
                                  w2_ref[kh * 3 + kw],
                                  preferred_element_type=jnp.float32)
    h2 = jnp.maximum(acc2 + b2_ref[...], 0.0).astype(jnp.bfloat16)

    # --- conv3 (1x1) + BN3, residual add (identity), final ReLU -------------
    a3 = jnp.dot(h2, w3_ref[...], preferred_element_type=jnp.float32)
    y = jnp.maximum(a3 + b3_ref[...] + x2d.astype(jnp.float32), 0.0)
    o_ref[0] = y.reshape(H, W, CP).astype(o_ref.dtype)


# ------------------------------- wrapper ----------------------------------- #

def _bottleneck_forward(xp, w1, w2, w3, b1, b2, b3):
    """xp: (B, H, W, CP) channel-padded NHWC input. Returns (B, H, W, CP)."""
    B, H, W, CP = xp.shape
    WP = w1.shape[1]
    return pl.pallas_call(
        _bottleneck_kernel,
        out_shape=jax.ShapeDtypeStruct((B, H, W, CP), xp.dtype),
        grid_spec=pltpu.PrefetchScalarGridSpec(
            num_scalar_prefetch=0,
            grid=(B,),
            in_specs=[
                pl.BlockSpec((1, H, W, CP), lambda b: (b, 0, 0, 0)),
                pl.BlockSpec((CP, WP), lambda b: (0, 0)),
                pl.BlockSpec((9, WP, WP), lambda b: (0, 0, 0)),
                pl.BlockSpec((WP, CP), lambda b: (0, 0)),
                pl.BlockSpec((1, WP), lambda b: (0, 0)),
                pl.BlockSpec((1, WP), lambda b: (0, 0)),
                pl.BlockSpec((1, CP), lambda b: (0, 0)),
            ],
            out_specs=pl.BlockSpec((1, H, W, CP), lambda b: (b, 0, 0, 0)),
            scratch_shapes=[pltpu.VMEM((H + 2, W + 2, WP), jnp.float32)],
        ),
        compiler_params=pltpu.CompilerParams(
            dimension_semantics=("parallel",),
            vmem_limit_bytes=32 * 1024 * 1024,
        ),
    )(xp, w1, w2, w3, b1, b2, b3)


class BottleneckPallas:
    """Pallas/TPU port of Bottleneck(inplanes, planes) forward (eval mode)."""

    expansion = 1

    def __init__(self, inplanes, planes, stride=1, downsample=None, groups=1,
                 base_width=64, dilation=1, eps=1e-5, key=None):
        assert stride == 1 and groups == 1 and dilation == 1 and downsample is None, \
            "TODO(synk): only the default Bottleneck configuration is implemented"
        width = int(planes * (base_width / 64.0)) * groups
        out_ch = planes * self.expansion
        assert inplanes == out_ch, \
            "identity residual requires inplanes == planes*expansion when downsample is None"
        self.inplanes, self.planes, self.width = inplanes, planes, width
        self.out_ch = out_ch

        key = jax.random.PRNGKey(0) if key is None else key
        ks = jax.random.split(key, 6)

        # Raw parameters (f32, HWIO conv layout) — kept for the reference path.
        self.w1_hwio = 0.1 * jax.random.normal(ks[0], (1, 1, inplanes, width), jnp.float32)
        self.w2_hwio = 0.1 * jax.random.normal(ks[1], (3, 3, width, width), jnp.float32)
        self.w3_hwio = 0.1 * jax.random.normal(ks[2], (1, 1, width, out_ch), jnp.float32)

        def make_bn(k, c):
            kg, kb, km, kv = jax.random.split(k, 4)
            gamma = 1.0 + 0.1 * jax.random.normal(kg, (c,), jnp.float32)
            beta = 0.1 * jax.random.normal(kb, (c,), jnp.float32)
            mean = 0.1 * jax.random.normal(km, (c,), jnp.float32)
            var = jax.random.uniform(kv, (c,), jnp.float32, 0.5, 1.5)
            scale = gamma / jnp.sqrt(var + eps)
            bias = beta - mean * scale
            return scale, bias

        self.s1, self.t1 = make_bn(ks[3], width)     # independent BN per conv
        self.s2, self.t2 = make_bn(ks[4], width)
        self.s3, self.t3 = make_bn(ks[5], out_ch)

        # Fold BN scales into the conv weights, pad channels to lane-dense
        # multiples of 128, cast weights to bf16 (biases stay f32).
        CP = _round_up(max(inplanes, out_ch), 128)
        WP = _round_up(width, 128)
        self.CP, self.WP = CP, WP

        w1m = self.w1_hwio.reshape(inplanes, width) * self.s1[None, :]
        w2m = (self.w2_hwio * self.s2[None, None, None, :]).reshape(9, width, width)
        w3m = self.w3_hwio.reshape(width, out_ch) * self.s3[None, :]

        self.w1_p = (jnp.zeros((CP, WP), jnp.bfloat16)
                     .at[:inplanes, :width].set(w1m.astype(jnp.bfloat16)))
        self.w2_p = (jnp.zeros((9, WP, WP), jnp.bfloat16)
                     .at[:, :width, :width].set(w2m.astype(jnp.bfloat16)))
        self.w3_p = (jnp.zeros((WP, CP), jnp.bfloat16)
                     .at[:width, :out_ch].set(w3m.astype(jnp.bfloat16)))
        self.b1_p = jnp.zeros((1, WP), jnp.float32).at[0, :width].set(self.t1)
        self.b2_p = jnp.zeros((1, WP), jnp.float32).at[0, :width].set(self.t2)
        self.b3_p = jnp.zeros((1, CP), jnp.float32).at[0, :out_ch].set(self.t3)

    def __call__(self, x_nchw):
        B, C, H, W = x_nchw.shape
        x = jnp.transpose(x_nchw, (0, 2, 3, 1))                    # NCHW -> NHWC
        xp = jnp.pad(x, ((0, 0), (0, 0), (0, 0), (0, self.CP - C)))  # lane-dense
        out = _bottleneck_forward(xp, self.w1_p, self.w2_p, self.w3_p,
                                  self.b1_p, self.b2_p, self.b3_p)
        out = out[..., :self.out_ch]
        return jnp.transpose(out, (0, 3, 1, 2))                    # NHWC -> NCHW


# ------------------------- pure-JAX reference check ------------------------ #

def _reference(block, x_nchw):
    x = jnp.transpose(x_nchw, (0, 2, 3, 1)).astype(jnp.float32)
    dn = ("NHWC", "HWIO", "NHWC")

    out = lax.conv_general_dilated(x, block.w1_hwio, (1, 1), "VALID",
                                   dimension_numbers=dn)
    out = jnp.maximum(out * block.s1 + block.t1, 0.0)
    out = lax.conv_general_dilated(out, block.w2_hwio, (1, 1), "SAME",
                                   dimension_numbers=dn)
    out = jnp.maximum(out * block.s2 + block.t2, 0.0)
    out = lax.conv_general_dilated(out, block.w3_hwio, (1, 1), "VALID",
                                   dimension_numbers=dn)
    out = out * block.s3 + block.t3
    out = jnp.maximum(out + x, 0.0)                 # identity residual + ReLU
    return jnp.transpose(out, (0, 3, 1, 2))


if __name__ == "__main__":
    key = jax.random.PRNGKey(0)
    kx, kp = jax.random.split(key)

    # inplanes == planes*expansion so the identity residual is valid.
    B, C, H, W = 2, 8, 16, 16
    planes = 8
    x = jax.random.normal(kx, (B, C, H, W), jnp.float32)

    block = BottleneckPallas(C, planes, key=kp)
    out = jax.block_until_ready(jax.jit(lambda v: block(v))(x))

    assert out.shape == (B, planes * BottleneckPallas.expansion, H, W), out.shape
    ref = jax.block_until_ready(_reference(block, x))
    # bf16 MXU inputs (f32 accumulation) vs a pure-f32 reference.
    np.testing.assert_allclose(np.asarray(out), np.asarray(ref),
                               rtol=2e-2, atol=2e-2)
    print("KERNEL_OK")
</pallas_src>

<mosaic_0001>
module attributes {stable_mosaic.version = 11 : i64} {
  func.func @_bottleneck_kernel(%arg0: i32, %arg1: memref<1x16x16x128xf32, #tpu.memory_space<vmem>>, %arg2: memref<128x128xbf16, #tpu.memory_space<vmem>>, %arg3: memref<9x128x128xbf16, #tpu.memory_space<vmem>>, %arg4: memref<128x128xbf16, #tpu.memory_space<vmem>>, %arg5: memref<1x128xf32, #tpu.memory_space<vmem>>, %arg6: memref<1x128xf32, #tpu.memory_space<vmem>>, %arg7: memref<1x128xf32, #tpu.memory_space<vmem>>, %arg8: memref<1x16x16x128xf32, #tpu.memory_space<vmem>>, %arg9: memref<18x18x128xf32, #tpu.memory_space<vmem>>) attributes {dimension_semantics = [#tpu.dimension_semantics<parallel>], iteration_bounds = array<i64: 2>, scalar_prefetch = 0 : i64, scratch_operands = 1 : i64, tpu.core_type = #tpu.core_type<tc>, window_params = [{transform_indices = @transform_0, window_bounds = array<i64: 1, 16, 16, 128>}, {pipeline_mode = #tpu.pipeline_mode<synchronous>, transform_indices = @transform_1, window_bounds = array<i64: 128, 128>}, {pipeline_mode = #tpu.pipeline_mode<synchronous>, transform_indices = @transform_2, window_bounds = array<i64: 9, 128, 128>}, {pipeline_mode = #tpu.pipeline_mode<synchronous>, transform_indices = @transform_3, window_bounds = array<i64: 128, 128>}, {pipeline_mode = #tpu.pipeline_mode<synchronous>, transform_indices = @transform_4, window_bounds = array<i64: 1, 128>}, {pipeline_mode = #tpu.pipeline_mode<synchronous>, transform_indices = @transform_5, window_bounds = array<i64: 1, 128>}, {pipeline_mode = #tpu.pipeline_mode<synchronous>, transform_indices = @transform_6, window_bounds = array<i64: 1, 128>}, {transform_indices = @transform_7, window_bounds = array<i64: 1, 16, 16, 128>}]} {
    %c0 = arith.constant 0 : index
    %c0_0 = arith.constant 0 : index
    %c0_1 = arith.constant 0 : index
    %c0_2 = arith.constant 0 : index
    %0 = vector.load %arg1[%c0, %c0_0, %c0_1, %c0_2] : memref<1x16x16x128xf32, #tpu.memory_space<vmem>>, vector<1x16x16x128xf32>
    %1 = vector.shape_cast %0 : vector<1x16x16x128xf32> to vector<16x16x128xf32>
    %2 = vector.shape_cast %1 : vector<16x16x128xf32> to vector<256x128xf32>
    %3 = arith.truncf %2 : vector<256x128xf32> to vector<256x128xbf16>
    %c0_3 = arith.constant 0 : index
    %c0_4 = arith.constant 0 : index
    %4 = vector.load %arg2[%c0_3, %c0_4] : memref<128x128xbf16, #tpu.memory_space<vmem>>, vector<128x128xbf16>
    %cst = arith.constant dense<0.000000e+00> : vector<256x128xf32>
    %5 = tpu.matmul %3, %4, %cst {dimension_numbers = #tpu.dot_dimension_numbers<[1], [0], [0], [1], [0, 0, 1, 1], [], []>} : vector<256x128xbf16>, vector<128x128xbf16>, vector<256x128xf32> -> vector<256x128xf32>
    %c0_5 = arith.constant 0 : index
    %c0_6 = arith.constant 0 : index
    %6 = vector.load %arg5[%c0_5, %c0_6] : memref<1x128xf32, #tpu.memory_space<vmem>>, vector<1x128xf32>
    %7 = vector.broadcast %6 : vector<1x128xf32> to vector<256x128xf32>
    %8 = arith.addf %5, %7 : vector<256x128xf32>
    %cst_7 = arith.constant 0.000000e+00 : f32
    %9 = vector.broadcast %cst_7 : f32 to vector<256x128xf32>
    %10 = arith.maximumf %8, %9 : vector<256x128xf32>
    %cst_8 = arith.constant 0.000000e+00 : f32
    %11 = vector.broadcast %cst_8 : f32 to vector<18x18x128xf32>
    %c0_9 = arith.constant 0 : index
    %c0_10 = arith.constant 0 : index
    %c0_11 = arith.constant 0 : index
    %12 = vector.load %arg9[%c0_9, %c0_10, %c0_11] : memref<18x18x128xf32, #tpu.memory_space<vmem>>, vector<18x18x128xf32>
    tpu.vector_store %arg9[%c0_9, %c0_10, %c0_11], %11 {strides = array<i32>} : memref<18x18x128xf32, #tpu.memory_space<vmem>>, vector<18x18x128xf32>,
    %13 = vector.shape_cast %10 : vector<256x128xf32> to vector<16x16x128xf32>
    %c1 = arith.constant 1 : index
    %c1_12 = arith.constant 1 : index
    %c0_13 = arith.constant 0 : index
    %14 = vector.load %arg9[%c1, %c1_12, %c0_13] : memref<18x18x128xf32, #tpu.memory_space<vmem>>, vector<16x16x128xf32>
    tpu.vector_store %arg9[%c1, %c1_12, %c0_13], %13 {strides = array<i32>} : memref<18x18x128xf32, #tpu.memory_space<vmem>>, vector<16x16x128xf32>,
    %cst_14 = arith.constant 0.000000e+00 : f32
    %15 = vector.broadcast %cst_14 : f32 to vector<256x128xf32>
    %c0_15 = arith.constant 0 : index
    %c0_16 = arith.constant 0 : index
    %c0_17 = arith.constant 0 : index
    %16 = vector.load %arg9[%c0_15, %c0_16, %c0_17] : memref<18x18x128xf32, #tpu.memory_space<vmem>>, vector<16x16x128xf32>
    %17 = vector.shape_cast %16 : vector<16x16x128xf32> to vector<256x128xf32>
    %18 = arith.truncf %17 : vector<256x128xf32> to vector<256x128xbf16>
    %c0_18 = arith.constant 0 : index
    %c0_19 = arith.constant 0 : index
    %c0_20 = arith.constant 0 : index
    %19 = vector.load %arg3[%c0_18, %c0_19, %c0_20] : memref<9x128x128xbf16, #tpu.memory_space<vmem>>, vector<1x128x128xbf16>
    %20 = vector.shape_cast %19 : vector<1x128x128xbf16> to vector<128x128xbf16>
    %cst_21 = arith.constant dense<0.000000e+00> : vector<256x128xf32>
    %21 = tpu.matmul %18, %20, %cst_21 {dimension_numbers = #tpu.dot_dimension_numbers<[1], [0], [0], [1], [0, 0, 1, 1], [], []>} : vector<256x128xbf16>, vector<128x128xbf16>, vector<256x128xf32> -> vector<256x128xf32>
    %22 = arith.addf %15, %21 : vector<256x128xf32>
    %c0_22 = arith.constant 0 : index
    %c1_23 = arith.constant 1 : index
    %c0_24 = arith.constant 0 : index
    %23 = vector.load %arg9[%c0_22, %c1_23, %c0_24] : memref<18x18x128xf32, #tpu.memory_space<vmem>>, vector<16x16x128xf32>
    %24 = vector.shape_cast %23 : vector<16x16x128xf32> to vector<256x128xf32>
    %25 = arith.truncf %24 : vector<256x128xf32> to vector<256x128xbf16>
    %c1_25 = arith.constant 1 : index
    %c0_26 = arith.constant 0 : index
    %c0_27 = arith.constant 0 : index
    %26 = vector.load %arg3[%c1_25, %c0_26, %c0_27] : memref<9x128x128xbf16, #tpu.memory_space<vmem>>, vector<1x128x128xbf16>
    %27 = vector.shape_cast %26 : vector<1x128x128xbf16> to vector<128x128xbf16>
    %cst_28 = arith.constant dense<0.000000e+00> : vector<256x128xf32>
    %28 = tpu.matmul %25, %27, %cst_28 {dimension_numbers = #tpu.dot_dimension_numbers<[1], [0], [0], [1], [0, 0, 1, 1], [], []>} : vector<256x128xbf16>, vector<128x128xbf16>, vector<256x128xf32> -> vector<256x128xf32>
    %29 = arith.addf %22, %28 : vector<256x128xf32>
    %c0_29 = arith.constant 0 : index
    %c2 = arith.constant 2 : index
    %c0_30 = arith.constant 0 : index
    %30 = vector.load %arg9[%c0_29, %c2, %c0_30] : memref<18x18x128xf32, #tpu.memory_space<vmem>>, vector<16x16x128xf32>
    %31 = vector.shape_cast %30 : vector<16x16x128xf32> to vector<256x128xf32>
    %32 = arith.truncf %31 : vector<256x128xf32> to vector<256x128xbf16>
    %c2_31 = arith.constant 2 : index
    %c0_32 = arith.constant 0 : index
    %c0_33 = arith.constant 0 : index
    %33 = vector.load %arg3[%c2_31, %c0_32, %c0_33] : memref<9x128x128xbf16, #tpu.memory_space<vmem>>, vector<1x128x128xbf16>
    %34 = vector.shape_cast %33 : vector<1x128x128xbf16> to vector<128x128xbf16>
    %cst_34 = arith.constant dense<0.000000e+00> : vector<256x128xf32>
    %35 = tpu.matmul %32, %34, %cst_34 {dimension_numbers = #tpu.dot_dimension_numbers<[1], [0], [0], [1], [0, 0, 1, 1], [], []>} : vector<256x128xbf16>, vector<128x128xbf16>, vector<256x128xf32> -> vector<256x128xf32>
    %36 = arith.addf %29, %35 : vector<256x128xf32>
    %c1_35 = arith.constant 1 : index
    %c0_36 = arith.constant 0 : index
    %c0_37 = arith.constant 0 : index
    %37 = vector.load %arg9[%c1_35, %c0_36, %c0_37] : memref<18x18x128xf32, #tpu.memory_space<vmem>>, vector<16x16x128xf32>
    %38 = vector.shape_cast %37 : vector<16x16x128xf32> to vector<256x128xf32>
    %39 = arith.truncf %38 : vector<256x128xf32> to vector<256x128xbf16>
    %c3 = arith.constant 3 : index
    %c0_38 = arith.constant 0 : index
    %c0_39 = arith.constant 0 : index
    %40 = vector.load %arg3[%c3, %c0_38, %c0_39] : memref<9x128x128xbf16, #tpu.memory_space<vmem>>, vector<1x128x128xbf16>
    %41 = vector.shape_cast %40 : vector<1x128x128xbf16> to vector<128x128xbf16>
    %cst_40 = arith.constant dense<0.000000e+00> : vector<256x128xf32>
    %42 = tpu.matmul %39, %41, %cst_40 {dimension_numbers = #tpu.dot_dimension_numbers<[1], [0], [0], [1], [0, 0, 1, 1], [], []>} : vector<256x128xbf16>, vector<128x128xbf16>, vector<256x128xf32> -> vector<256x128xf32>
    %43 = arith.addf %36, %42 : vector<256x128xf32>
    %c1_41 = arith.constant 1 : index
    %c1_42 = arith.constant 1 : index
    %c0_43 = arith.constant 0 : index
    %44 = vector.load %arg9[%c1_41, %c1_42, %c0_43] : memref<18x18x128xf32, #tpu.memory_space<vmem>>, vector<16x16x128xf32>
    %45 = vector.shape_cast %44 : vector<16x16x128xf32> to vector<256x128xf32>
    %46 = arith.truncf %45 : vector<256x128xf32> to vector<256x128xbf16>
    %c4 = arith.constant 4 : index
    %c0_44 = arith.constant 0 : index
    %c0_45 = arith.constant 0 : index
    %47 = vector.load %arg3[%c4, %c0_44, %c0_45] : memref<9x128x128xbf16, #tpu.memory_space<vmem>>, vector<1x128x128xbf16>
    %48 = vector.shape_cast %47 : vector<1x128x128xbf16> to vector<128x128xbf16>
    %cst_46 = arith.constant dense<0.000000e+00> : vector<256x128xf32>
    %49 = tpu.matmul %46, %48, %cst_46 {dimension_numbers = #tpu.dot_dimension_numbers<[1], [0], [0], [1], [0, 0, 1, 1], [], []>} : vector<256x128xbf16>, vector<128x128xbf16>, vector<256x128xf32> -> vector<256x128xf32>
    %50 = arith.addf %43, %49 : vector<256x128xf32>
    %c1_47 = arith.constant 1 : index
    %c2_48 = arith.constant 2 : index
    %c0_49 = arith.constant 0 : index
    %51 = vector.load %arg9[%c1_47, %c2_48, %c0_49] : memref<18x18x128xf32, #tpu.memory_space<vmem>>, vector<16x16x128xf32>
    %52 = vector.shape_cast %51 : vector<16x16x128xf32> to vector<256x128xf32>
    %53 = arith.truncf %52 : vector<256x128xf32> to vector<256x128xbf16>
    %c5 = arith.constant 5 : index
    %c0_50 = arith.constant 0 : index
    %c0_51 = arith.constant 0 : index
    %54 = vector.load %arg3[%c5, %c0_50, %c0_51] : memref<9x128x128xbf16, #tpu.memory_space<vmem>>, vector<1x128x128xbf16>
    %55 = vector.shape_cast %54 : vector<1x128x128xbf16> to vector<128x128xbf16>
    %cst_52 = arith.constant dense<0.000000e+00> : vector<256x128xf32>
    %56 = tpu.matmul %53, %55, %cst_52 {dimension_numbers = #tpu.dot_dimension_numbers<[1], [0], [0], [1], [0, 0, 1, 1], [], []>} : vector<256x128xbf16>, vector<128x128xbf16>, vector<256x128xf32> -> vector<256x128xf32>
    %57 = arith.addf %50, %56 : vector<256x128xf32>
    %c2_53 = arith.constant 2 : index
    %c0_54 = arith.constant 0 : index
    %c0_55 = arith.constant 0 : index
    %58 = vector.load %arg9[%c2_53, %c0_54, %c0_55] : memref<18x18x128xf32, #tpu.memory_space<vmem>>, vector<16x16x128xf32>
    %59 = vector.shape_cast %58 : vector<16x16x128xf32> to vector<256x128xf32>
    %60 = arith.truncf %59 : vector<256x128xf32> to vector<256x128xbf16>
    %c6 = arith.constant 6 : index
    %c0_56 = arith.constant 0 : index
    %c0_57 = arith.constant 0 : index
    %61 = vector.load %arg3[%c6, %c0_56, %c0_57] : memref<9x128x128xbf16, #tpu.memory_space<vmem>>, vector<1x128x128xbf16>
    %62 = vector.shape_cast %61 : vector<1x128x128xbf16> to vector<128x128xbf16>
    %cst_58 = arith.constant dense<0.000000e+00> : vector<256x128xf32>
    %63 = tpu.matmul %60, %62, %cst_58 {dimension_numbers = #tpu.dot_dimension_numbers<[1], [0], [0], [1], [0, 0, 1, 1], [], []>} : vector<256x128xbf16>, vector<128x128xbf16>, vector<256x128xf32> -> vector<256x128xf32>
    %64 = arith.addf %57, %63 : vector<256x128xf32>
    %c2_59 = arith.constant 2 : index
    %c1_60 = arith.constant 1 : index
    %c0_61 = arith.constant 0 : index
    %65 = vector.load %arg9[%c2_59, %c1_60, %c0_61] : memref<18x18x128xf32, #tpu.memory_space<vmem>>, vector<16x16x128xf32>
    %66 = vector.shape_cast %65 : vector<16x16x128xf32> to vector<256x128xf32>
    %67 = arith.truncf %66 : vector<256x128xf32> to vector<256x128xbf16>
    %c7 = arith.constant 7 : index
    %c0_62 = arith.constant 0 : index
    %c0_63 = arith.constant 0 : index
    %68 = vector.load %arg3[%c7, %c0_62, %c0_63] : memref<9x128x128xbf16, #tpu.memory_space<vmem>>, vector<1x128x128xbf16>
    %69 = vector.shape_cast %68 : vector<1x128x128xbf16> to vector<128x128xbf16>
    %cst_64 = arith.constant dense<0.000000e+00> : vector<256x128xf32>
    %70 = tpu.matmul %67, %69, %cst_64 {dimension_numbers = #tpu.dot_dimension_numbers<[1], [0], [0], [1], [0, 0, 1, 1], [], []>} : vector<256x128xbf16>, vector<128x128xbf16>, vector<256x128xf32> -> vector<256x128xf32>
    %71 = arith.addf %64, %70 : vector<256x128xf32>
    %c2_65 = arith.constant 2 : index
    %c2_66 = arith.constant 2 : index
    %c0_67 = arith.constant 0 : index
    %72 = vector.load %arg9[%c2_65, %c2_66, %c0_67] : memref<18x18x128xf32, #tpu.memory_space<vmem>>, vector<16x16x128xf32>
    %73 = vector.shape_cast %72 : vector<16x16x128xf32> to vector<256x128xf32>
    %74 = arith.truncf %73 : vector<256x128xf32> to vector<256x128xbf16>
    %c8 = arith.constant 8 : index
    %c0_68 = arith.constant 0 : index
    %c0_69 = arith.constant 0 : index
    %75 = vector.load %arg3[%c8, %c0_68, %c0_69] : memref<9x128x128xbf16, #tpu.memory_space<vmem>>, vector<1x128x128xbf16>
    %76 = vector.shape_cast %75 : vector<1x128x128xbf16> to vector<128x128xbf16>
    %cst_70 = arith.constant dense<0.000000e+00> : vector<256x128xf32>
    %77 = tpu.matmul %74, %76, %cst_70 {dimension_numbers = #tpu.dot_dimension_numbers<[1], [0], [0], [1], [0, 0, 1, 1], [], []>} : vector<256x128xbf16>, vector<128x128xbf16>, vector<256x128xf32> -> vector<256x128xf32>
    %78 = arith.addf %71, %77 : vector<256x128xf32>
    %c0_71 = arith.constant 0 : index
    %c0_72 = arith.constant 0 : index
    %79 = vector.load %arg6[%c0_71, %c0_72] : memref<1x128xf32, #tpu.memory_space<vmem>>, vector<1x128xf32>
    %80 = vector.broadcast %79 : vector<1x128xf32> to vector<256x128xf32>
    %81 = arith.addf %78, %80 : vector<256x128xf32>
    %cst_73 = arith.constant 0.000000e+00 : f32
    %82 = vector.broadcast %cst_73 : f32 to vector<256x128xf32>
    %83 = arith.maximumf %81, %82 : vector<256x128xf32>
    %84 = arith.truncf %83 : vector<256x128xf32> to vector<256x128xbf16>
    %c0_74 = arith.constant 0 : index
    %c0_75 = arith.constant 0 : index
    %85 = vector.load %arg4[%c0_74, %c0_75] : memref<128x128xbf16, #tpu.memory_space<vmem>>, vector<128x128xbf16>
    %cst_76 = arith.constant dense<0.000000e+00> : vector<256x128xf32>
    %86 = tpu.matmul %84, %85, %cst_76 {dimension_numbers = #tpu.dot_dimension_numbers<[1], [0], [0], [1], [0, 0, 1, 1], [], []>} : vector<256x128xbf16>, vector<128x128xbf16>, vector<256x128xf32> -> vector<256x128xf32>
    %c0_77 = arith.constant 0 : index
    %c0_78 = arith.constant 0 : index
    %87 = vector.load %arg7[%c0_77, %c0_78] : memref<1x128xf32, #tpu.memory_space<vmem>>, vector<1x128xf32>
    %88 = vector.broadcast %87 : vector<1x128xf32> to vector<256x128xf32>
    %89 = arith.addf %86, %88 : vector<256x128xf32>
    %90 = arith.addf %89, %2 : vector<256x128xf32>
    %cst_79 = arith.constant 0.000000e+00 : f32
    %91 = vector.broadcast %cst_79 : f32 to vector<256x128xf32>
    %92 = arith.maximumf %90, %91 : vector<256x128xf32>
    %93 = vector.shape_cast %92 : vector<256x128xf32> to vector<16x16x128xf32>
    %c0_80 = arith.constant 0 : index
    %c0_81 = arith.constant 0 : index
    %c0_82 = arith.constant 0 : index
    %c0_83 = arith.constant 0 : index
    %94 = vector.load %arg8[%c0_80, %c0_81, %c0_82, %c0_83] : memref<1x16x16x128xf32, #tpu.memory_space<vmem>>, vector<1x16x16x128xf32>
    %95 = vector.shape_cast %94 : vector<1x16x16x128xf32> to vector<16x16x128xf32>
    %96 = vector.shape_cast %93 : vector<16x16x128xf32> to vector<1x16x16x128xf32>
    tpu.vector_store %arg8[%c0_80, %c0_81, %c0_82, %c0_83], %96 {strides = array<i32>} : memref<1x16x16x128xf32, #tpu.memory_space<vmem>>, vector<1x16x16x128xf32>,
    return
  }
  func.func @transform_0(%arg0: i32) -> (i32, i32, i32, i32) {
    %c0_i32 = arith.constant 0 : i32
    %c0_i32_0 = arith.constant 0 : i32
    %c0_i32_1 = arith.constant 0 : i32
    %c0_i32_2 = arith.constant 0 : i32
    return %arg0, %c0_i32, %c0_i32_0, %c0_i32_1 : i32, i32, i32, i32
  }
  func.func @transform_1(%arg0: i32) -> (i32, i32) {
    %c0_i32 = arith.constant 0 : i32
    %c0_i32_0 = arith.constant 0 : i32
    %c0_i32_1 = arith.constant 0 : i32
    return %c0_i32, %c0_i32_0 : i32, i32
  }
  func.func @transform_2(%arg0: i32) -> (i32, i32, i32) {
    %c0_i32 = arith.constant 0 : i32
    %c0_i32_0 = arith.constant 0 : i32
    %c0_i32_1 = arith.constant 0 : i32
    %c0_i32_2 = arith.constant 0 : i32
    return %c0_i32, %c0_i32_0, %c0_i32_1 : i32, i32, i32
  }
  func.func @transform_3(%arg0: i32) -> (i32, i32) {
    %c0_i32 = arith.constant 0 : i32
    %c0_i32_0 = arith.constant 0 : i32
    %c0_i32_1 = arith.constant 0 : i32
    return %c0_i32, %c0_i32_0 : i32, i32
  }
  func.func @transform_4(%arg0: i32) -> (i32, i32) {
    %c0_i32 = arith.constant 0 : i32
    %c0_i32_0 = arith.constant 0 : i32
    %c0_i32_1 = arith.constant 0 : i32
    return %c0_i32, %c0_i32_0 : i32, i32
  }
  func.func @transform_5(%arg0: i32) -> (i32, i32) {
    %c0_i32 = arith.constant 0 : i32
    %c0_i32_0 = arith.constant 0 : i32
    %c0_i32_1 = arith.constant 0 : i32
    return %c0_i32, %c0_i32_0 : i32, i32
  }
  func.func @transform_6(%arg0: i32) -> (i32, i32) {
    %c0_i32 = arith.constant 0 : i32
    %c0_i32_0 = arith.constant 0 : i32
    %c0_i32_1 = arith.constant 0 : i32
    return %c0_i32, %c0_i32_0 : i32, i32
  }
  func.func @transform_7(%arg0: i32) -> (i32, i32, i32, i32) {
    %c0_i32 = arith.constant 0 : i32
    %c0_i32_0 = arith.constant 0 : i32
    %c0_i32_1 = arith.constant 0 : i32
    %c0_i32_2 = arith.constant 0 : i32
    return %arg0, %c0_i32, %c0_i32_0, %c0_i32_1 : i32, i32, i32, i32
  }
}

</mosaic_0001>

<bundles_post_ra>
// kernel: _lambda_.1
= control target key start
LH: loop header
LB: loop body
LE: loop exit
PB: predicated region body
PF: predicated region fallthrough
CT: control target
= control target key end

     0   :  { %s5315_s24 = smov 0   ;;  %s6134_s0 = inlined_call_operand.vmem [shape: f32[2,16,16,128], index: 0, kind: input, shape index: {}]   ;;  %s6135_s1 = inlined_call_operand.vmem [shape: bf16[128,128], index: 1, kind: input, shape index: {}]   ;;  %s6136_s2 = inlined_call_operand.vmem [shape: bf16[9,128,128], index: 2, kind: input, shape index: {}]   ;;  %s6137_s3 = inlined_call_operand.vmem [shape: bf16[128,128], index: 3, kind: input, shape index: {}]   ;;  %s6138_s4 = inlined_call_operand.vmem [shape: f32[1,128], index: 4, kind: input, shape index: {}]   ;;  %s6139_s5 = inlined_call_operand.vmem [shape: f32[1,128], index: 5, kind: input, shape index: {}]   ;;  %s6140_s6 = inlined_call_operand.vmem [shape: f32[1,128], index: 6, kind: input, shape index: {}]   ;;  %s6141_s7 = inlined_call_operand.vmem [shape: f32[2,16,16,128], index: 7, kind: output, shape index: {}]  }
   0x1 LB: > { %s3839_s25 = sadd.s32 4294967295, %s5271_s24   ;;  %p3843_p0 = scmp.ge.s32.totalorder %s5271_s24, 1  ;;  %s5271_s24 = sphi %s5315_s24, %s17_s24  }
   0x2   : > { %p237_p1 = scmp.lt.s32.totalorder %s5271_s24, 3 }
   0x4   : > { %p238_p2 = pnand %p3843_p0, %p237_p1 }
   0x5   : > { %v5144_v0 = vld [vmem:[%s6135_s1] sm:$0xff] (!%p238_p2)   ;;  %p269_p3 = scmp.lt.s32.totalorder (!%p238_p2), %s3839_s25, 1  ;;  %v5145_v1 = vld [vmem:[%s6135_s1 + $0x8] sm:$0xff] (!%p238_p2)   ;;  %v5146_v2 = vld [vmem:[%s6135_s1 + $0x10] sm:$0xff] (!%p238_p2)   ;;  %v5273_v62 = vmov (!%p238_p2), 0.0  }
   0x6   : > { %241 = sbr.rel (%p238_p2) target bundleno = 1090 (0x442), region = 48  ;;  %4335 = vmatprep.subr.bf16.mxu0 (!%p238_p2), %v5144_v0  ;;  %v5147_v3 = vld [vmem:[%s6135_s1 + $0x18] sm:$0xff] (!%p238_p2)   ;;  %v5148_v7 = vld [vmem:[%s6135_s1 + $0x20] sm:$0xff] (!%p238_p2)   ;;  %v5149_v8 = vld [vmem:[%s6135_s1 + $0x28] sm:$0xff] (!%p238_p2)   ;;  %598 = vst [vmem:[#allocation2 + $0x30] sm:$0xff] (!%p238_p2), %v5273_v62 }
   0x7   : > { %4336 = vmatpush3.bf16.msra.mxu0 (!%p238_p2), %v5144_v0  ;;  %v5150_v9 = vld [vmem:[%s6135_s1 + $0x30] sm:$0xff] (!%p238_p2)   ;;  %v5151_v10 = vld [vmem:[%s6135_s1 + $0x38] sm:$0xff] (!%p238_p2)   ;;  %v5152_v15 = vld [vmem:[%s6136_s2 + $0x40] sm:$0xff] (!%p238_p2)   ;;  %599 = vst [vmem:[#allocation2 + $0x38] sm:$0xff] (!%p238_p2), %v5273_v62 }
   0x8   : > { %4337 = vmatprep.subr.bf16.mxu0 (!%p238_p2), %v5145_v1  ;;  %v5153_v17 = vld [vmem:[%s6136_s2 + $0x48] sm:$0xff] (!%p238_p2)   ;;  %v5154_v23 = vld [vmem:[%s6136_s2 + $0x50] sm:$0xff] (!%p238_p2)   ;;  %v5155_v25 = vld [vmem:[%s6136_s2 + $0x58] sm:$0xff] (!%p238_p2)   ;;  %592 = vst [vmem:[#allocation2] sm:$0xff] (!%p238_p2), %v5273_v62 }
   0x9   : > { %v5156_v60 = vld [vmem:[%s6136_s2 + $0x60] sm:$0xff] (!%p238_p2)   ;;  %v5157_v61 = vld [vmem:[%s6136_s2 + $0x68] sm:$0xff] (!%p238_p2)   ;;  %593 = vst [vmem:[#allocation2 + $0x8] sm:$0xff] (!%p238_p2), %v5273_v62  ;;  %594 = vst [vmem:[#allocation2 + $0x10] sm:$0x3] (!%p238_p2), %v5273_v62 }
   0xa   : > { %595 = vst [vmem:[#allocation2 + $0x18] sm:$0xff] (!%p238_p2), %v5273_v62  ;;  %596 = vst [vmem:[#allocation2 + $0x20] sm:$0xff] (!%p238_p2), %v5273_v62  ;;  %v5158_v63 = vld [vmem:[%s6136_s2 + $0x70] sm:$0xff] (!%p238_p2)   ;;  %v5159_v0 = vld [vmem:[%s6136_s2 + $0x78] sm:$0xff] (!%p238_p2)  }
   0xb   : > { %4338 = vmatpush3.bf16.msra.mxu0 (!%p238_p2), %v5145_v1  ;;  %597 = vst [vmem:[#allocation2 + $0x28] sm:$0x3] (!%p238_p2), %v5273_v62  ;;  %600 = vst [vmem:[#allocation2 + $0x40] sm:$0x3] (!%p238_p2), %v5273_v62 }
   0xc   : > { %4339 = vmatprep.subr.bf16.mxu0 (!%p238_p2), %v5146_v2  ;;  %601 = vst [vmem:[#allocation2 + $0x48] sm:$0xff] (!%p238_p2), %v5273_v62  ;;  %602 = vst [vmem:[#allocation2 + $0x50] sm:$0xff] (!%p238_p2), %v5273_v62 }
   0xd   : > { %s6143_s25 = smov (!%p269_p3, %s3839_s25), 1  ;;  %603 = vst [vmem:[#allocation2 + $0x58] sm:$0x3] %v5273_v62  ;;  %604 = vst [vmem:[#allocation2 + $0x60] sm:$0xff] %v5273_v62 }
   0xe   : > { %s4069_s9 = sshll.u32 %s6143_s25, 8  ;;  %605 = vst [vmem:[#allocation2 + $0x68] sm:$0xff] %v5273_v62  ;;  %606 = vst [vmem:[#allocation2 + $0x70] sm:$0x3] %v5273_v62 }
   0xf   : > { %s5340_s12 = scalar_lea.vmem %s6134_s0, %s4069_s9  ;;  %4340 = vmatpush3.bf16.msra.mxu0 %v5146_v2  ;;  %607 = vst [vmem:[#allocation2 + $0x78] sm:$0xff] %v5273_v62  ;;  %608 = vst [vmem:[#allocation2 + $0x80] sm:$0xff] %v5273_v62  ;;  %s6037_s20 = scalar_lea.vmem %s6141_s7, %s4069_s9 }
  0x10   : > { %v280_v4 = vld [vmem:[%s5340_s12] sm:$0xff]  ;;  %v281_v5 = vld [vmem:[%s5340_s12 + $0x8] sm:$0xff]  ;;  %4341 = vmatprep.subr.bf16.mxu0 %v5147_v3  ;;  %v282_v11 = vld [vmem:[%s5340_s12 + $0x10] sm:$0xff]  ;;  %609 = vst [vmem:[#allocation2 + $0x88] sm:$0x3] %v5273_v62 }
  0x11   : > { %v312_v6 = vpack.c.bf16 %v281_v5, %v280_v4  ;;  %v283_v12 = vld [vmem:[%s5340_s12 + $0x18] sm:$0xff]  ;;  %v284_v13 = vld [vmem:[%s5340_s12 + $0x20] sm:$0xff]  ;;  %v285_v14 = vld [vmem:[%s5340_s12 + $0x28] sm:$0xff]  ;;  %610 = vst [vmem:[#allocation2 + $0x90] sm:$0xff] %v5273_v62 }
  0x12   : > { %v313_v16 = vpack.c.bf16 %v283_v12, %v282_v11  ;;  %v314_v18 = vpack.c.bf16 %v285_v14, %v284_v13  ;;  %v286_v19 = vld [vmem:[%s5340_s12 + $0x30] sm:$0xff]  ;;  %v287_v20 = vld [vmem:[%s5340_s12 + $0x38] sm:$0xff]  ;;  %v288_v21 = vld [vmem:[%s5340_s12 + $0x40] sm:$0xff]  ;;  %611 = vst [vmem:[#allocation2 + $0x98] sm:$0xff] %v5273_v62 }
  0x13   : > { %4351 = vmatprep.mubr.bf16.mxu0 %v312_v6  ;;  %4342 = vmatpush3.bf16.msra.mxu0 %v5147_v3  ;;  %v289_v22 = vld [vmem:[%s5340_s12 + $0x48] sm:$0xff]  ;;  %v315_v24 = vpack.c.bf16 %v287_v20, %v286_v19  ;;  %v290_v27 = vld [vmem:[%s5340_s12 + $0x50] sm:$0xff]  ;;  %v291_v28 = vld [vmem:[%s5340_s12 + $0x58] sm:$0xff]  ;;  %612 = vst [vmem:[#allocation2 + $0xa0] sm:$0x3] %v5273_v62 }
  0x14   : > { %4343 = vmatprep.subr.bf16.mxu0 %v5148_v7  ;;  %v316_v26 = vpack.c.bf16 %v289_v22, %v288_v21  ;;  %v292_v29 = vld [vmem:[%s5340_s12 + $0x60] sm:$0xff]  ;;  %v293_v30 = vld [vmem:[%s5340_s12 + $0x68] sm:$0xff]  ;;  %v317_v31 = vpack.c.bf16 %v291_v28, %v290_v27  ;;  %v294_v33 = vld [vmem:[%s5340_s12 + $0x70] sm:$0xff]  ;;  %613 = vst [vmem:[#allocation2 + $0xa8] sm:$0xff] %v5273_v62 }
  0x15   : > { %v318_v32 = vpack.c.bf16 %v293_v30, %v292_v29  ;;  %v295_v34 = vld [vmem:[%s5340_s12 + $0x78] sm:$0xff]  ;;  %v296_v35 = vld [vmem:[%s5340_s12 + $0x80] sm:$0xff]  ;;  %v297_v36 = vld [vmem:[%s5340_s12 + $0x88] sm:$0xff]  ;;  %614 = vst [vmem:[#allocation2 + $0xb0] sm:$0xff] %v5273_v62 }
  0x16   : > { %v319_v37 = vpack.c.bf16 %v295_v34, %v294_v33  ;;  %v320_v38 = vpack.c.bf16 %v297_v36, %v296_v35  ;;  %v298_v39 = vld [vmem:[%s5340_s12 + $0x90] sm:$0xff]  ;;  %v299_v40 = vld [vmem:[%s5340_s12 + $0x98] sm:$0xff]  ;;  %v300_v41 = vld [vmem:[%s5340_s12 + $0xa0] sm:$0xff]  ;;  %615 = vst [vmem:[#allocation2 + $0xb8] sm:$0x3] %v5273_v62 }
  0x17   : > { %4344 = vmatpush3.bf16.msra.mxu0 %v5148_v7  ;;  %v301_v42 = vld [vmem:[%s5340_s12 + $0xa8] sm:$0xff]  ;;  %v321_v43 = vpack.c.bf16 %v299_v40, %v298_v39  ;;  %v302_v45 = vld [vmem:[%s5340_s12 + $0xb0] sm:$0xff]  ;;  %v303_v46 = vld [vmem:[%s5340_s12 + $0xb8] sm:$0xff]  ;;  %616 = vst [vmem:[#allocation2 + $0xc0] sm:$0xff] %v5273_v62 }
  0x18   : > { %4345 = vmatprep.subr.bf16.mxu0 %v5149_v8  ;;  %v322_v44 = vpack.c.bf16 %v301_v42, %v300_v41  ;;  %v304_v47 = vld [vmem:[%s5340_s12 + $0xc0] sm:$0xff]  ;;  %v305_v48 = vld [vmem:[%s5340_s12 + $0xc8] sm:$0xff]  ;;  %v323_v49 = vpack.c.bf16 %v303_v46, %v302_v45  ;;  %v306_v51 = vld [vmem:[%s5340_s12 + $0xd0] sm:$0xff]  ;;  %617 = vst [vmem:[#allocation2 + $0xc8] sm:$0xff] %v5273_v62 }
  0x19   : > { %v324_v50 = vpack.c.bf16 %v305_v48, %v304_v47  ;;  %v307_v52 = vld [vmem:[%s5340_s12 + $0xd8] sm:$0xff]  ;;  %v308_v53 = vld [vmem:[%s5340_s12 + $0xe0] sm:$0xff]  ;;  %v309_v54 = vld [vmem:[%s5340_s12 + $0xe8] sm:$0xff]  ;;  %618 = vst [vmem:[#allocation2 + $0xd0] sm:$0x3] %v5273_v62 }
  0x1a   : > { %v325_v55 = vpack.c.bf16 %v307_v52, %v306_v51  ;;  %v326_v56 = vpack.c.bf16 %v309_v54, %v308_v53  ;;  %v310_v57 = vld [vmem:[%s5340_s12 + $0xf0] sm:$0xff]  ;;  %v311_v58 = vld [vmem:[%s5340_s12 + $0xf8] sm:$0xff]  ;;  %619 = vst [vmem:[#allocation2 + $0xd8] sm:$0xff] %v5273_v62  ;;  %620 = vst [vmem:[#allocation2 + $0xe0] sm:$0xff] %v5273_v62 }
  0x1b   : > { %4346 = vmatpush3.bf16.msra.mxu0 %v5149_v8  ;;  %v327_v59 = vpack.c.bf16 %v311_v58, %v310_v57  ;;  %621 = vst [vmem:[#allocation2 + $0xe8] sm:$0x3] %v5273_v62  ;;  %622 = vst [vmem:[#allocation2 + $0xf0] sm:$0xff] %v5273_v62  ;;  %v743_v1 = vld [vmem:[#allocation2 + $0x1] sm:$0xff]  ;;  %v744_v2 = vld [vmem:[#allocation2 + $0x9] sm:$0xff] }
  0x1c   : > { %4347 = vmatprep.subr.bf16.mxu0 %v5150_v9  ;;  %623 = vst [vmem:[#allocation2 + $0xf8] sm:$0xff] %v5273_v62  ;;  %624 = vst [vmem:[#allocation2 + $0x100] sm:$0x3] %v5273_v62  ;;  %v775_v3 = vpack.c.bf16 %v744_v2, %v743_v1  ;;  %v5416_v4 = vld [vmem:[%s6136_s2 + $0xc0] sm:$0xff]   ;;  %v5423_v5 = vld [vmem:[%s6136_s2 + $0xc8] sm:$0xff]  }
  0x1d   : > { %625 = vst [vmem:[#allocation2 + $0x108] sm:$0xff] %v5273_v62  ;;  %626 = vst [vmem:[#allocation2 + $0x110] sm:$0xff] %v5273_v62  ;;  %4863 = vmatprep.subr.bf16.mxu1 %v5416_v4  ;;  %v5430_v6 = vld [vmem:[%s6136_s2 + $0xd0] sm:$0xff]   ;;  %v5437_v7 = vld [vmem:[%s6136_s2 + $0xd8] sm:$0xff]  }
  0x1e   : > { %627 = vst [vmem:[#allocation2 + $0x118] sm:$0x3] %v5273_v62  ;;  %628 = vst [vmem:[#allocation2 + $0x120] sm:$0xff] %v5273_v62  ;;  %4871 = vmatpush3.bf16.msra.mxu1 %v5416_v4  ;;  %v5444_v8 = vld [vmem:[%s6136_s2 + $0xe0] sm:$0xff]   ;;  %v5461_v11 = vld [vmem:[%s6136_s2 + $0xf0] sm:$0xff]  }
  0x1f   : > { %4348 = vmatpush3.bf16.msra.mxu0 %v5150_v9  ;;  %629 = vst [vmem:[#allocation2 + $0x128] sm:$0xff] %v5273_v62  ;;  %630 = vst [vmem:[#allocation2 + $0x130] sm:$0x3] %v5273_v62  ;;  %4864 = vmatprep.subr.bf16.mxu1 %v5423_v5  ;;  %v5451_v9 = vld [vmem:[%s6136_s2 + $0xe8] sm:$0xff]   ;;  %v5468_v12 = vld [vmem:[%s6136_s2 + $0xf8] sm:$0xff]  }
  0x20   : > { %4349 = vmatprep.subr.bf16.mxu0 %v5151_v10  ;;  %631 = vst [vmem:[#allocation2 + $0x138] sm:$0xff] %v5273_v62  ;;  %632 = vst [vmem:[#allocation2 + $0x140] sm:$0xff] %v5273_v62  ;;  %v5475_v13 = vld [vmem:[%s6136_s2 + $0x100] sm:$0xff]   ;;  %v5170_v30 = vld [vmem:[%s6136_s2 + $0x8] sm:$0xff]  }
  0x21   : > { %633 = vst [vmem:[#allocation2 + $0x148] sm:$0x3] %v5273_v62  ;;  %634 = vst [vmem:[#allocation2 + $0x150] sm:$0xff] %v5273_v62  ;;  %v5481_v14 = vld [vmem:[%s6138_s4] ss:$0 sm:$0xff]  ;;  %v5172_v40 = vld [vmem:[%s6136_s2 + $0x10] sm:$0xff]  }
  0x22   : > { %635 = vst [vmem:[#allocation2 + $0x158] sm:$0xff] %v5273_v62  ;;  %636 = vst [vmem:[#allocation2 + $0x160] sm:$0x3] %v5273_v62  ;;  %4872 = vmatpush3.bf16.msra.mxu1 %v5423_v5  ;;  %v5174_v46 = vld [vmem:[%s6136_s2 + $0x18] sm:$0xff]  }
  0x23   : > { %4350 = vmatpush3.bf16.msra.mxu0 %v5151_v10  ;;  %637 = vst [vmem:[#allocation2 + $0x168] sm:$0xff] %v5273_v62  ;;  %638 = vst [vmem:[#allocation2 + $0x170] sm:$0xff] %v5273_v62  ;;  %4865 = vmatprep.subr.bf16.mxu1 %v5430_v6  ;;  %v5168_v10 = vld [vmem:[%s6136_s2] sm:$0xff]  }
  0x24   : > { %4383 = vmatprep.subr.bf16.mxu0 %v5152_v15  ;;  %639 = vst [vmem:[#allocation2 + $0x178] sm:$0x3] %v5273_v62  ;;  %640 = vst [vmem:[#allocation2 + $0x180] sm:$0xff] %v5273_v62 }
  0x25   : > { %641 = vst [vmem:[#allocation2 + $0x188] sm:$0xff] %v5273_v62  ;;  %642 = vst [vmem:[#allocation2 + $0x190] sm:$0x3] %v5273_v62 }
  0x26   : > { %4352 = vmatmul.mubr.bf16.vlgmr.msra.gmra.mrb[0].mxu0 %v313_v16  ;;  %643 = vst [vmem:[#allocation2 + $0x198] sm:$0xff] %v5273_v62  ;;  %644 = vst [vmem:[#allocation2 + $0x1a0] sm:$0xff] %v5273_v62  ;;  %4873 = vmatpush3.bf16.msra.mxu1 %v5430_v6 }
  0x27   : > { %4355 = vmatprep.mubr.bf16.mxu0 %v314_v18  ;;  %4384 = vmatpush3.bf16.msra.mxu0 %v5152_v15  ;;  %645 = vst [vmem:[#allocation2 + $0x1a8] sm:$0x3] %v5273_v62  ;;  %v5178_v62 = vld [vmem:[%s6136_s2 + $0x28] sm:$0xff]  }
  0x28   : > { %4385 = vmatprep.subr.bf16.mxu0 %v5153_v17  ;;  %4866 = vmatprep.subr.bf16.mxu1 %v5437_v7 }
  0x2a   : > { %4874 = vmatpush3.bf16.msra.mxu1 %v5437_v7 }
  0x2b   : > { %4386 = vmatpush3.bf16.msra.mxu0 %v5153_v17  ;;  %4867 = vmatprep.subr.bf16.mxu1 %v5444_v8 }
  0x2c   : > { %4387 = vmatprep.subr.bf16.mxu0 %v5154_v23 }
  0x2e   : > { %4356 = vmatmul.mubr.bf16.gmra.mrb[4].mxu0 %v315_v24  ;;  %4875 = vmatpush3.bf16.msra.mxu1 %v5444_v8 }
  0x2f   : > { %4359 = vmatprep.mubr.bf16.mxu0 %v316_v26  ;;  %4388 = vmatpush3.bf16.msra.mxu0 %v5154_v23 }
  0x30   : > { %4389 = vmatprep.subr.bf16.mxu0 %v5155_v25  ;;  %4868 = vmatprep.subr.bf16.mxu1 %v5451_v9 }
  0x32   : > { %4876 = vmatpush3.bf16.msra.mxu1 %v5451_v9 }
  0x33   : > { %4390 = vmatpush3.bf16.msra.mxu0 %v5155_v25  ;;  %4869 = vmatprep.subr.bf16.mxu1 %v5461_v11 }
  0x34   : > { %4391 = vmatprep.subr.bf16.mxu0 %v5156_v60 }
  0x36   : > { %4360 = vmatmul.mubr.bf16.gmra.mrb[8].mxu0 %v317_v31  ;;  %4877 = vmatpush3.bf16.msra.mxu1 %v5461_v11 }
  0x37   : > { %4363 = vmatprep.mubr.bf16.mxu0 %v318_v32  ;;  %4392 = vmatpush3.bf16.msra.mxu0 %v5156_v60 }
  0x38   : > { %4393 = vmatprep.subr.bf16.mxu0 %v5157_v61  ;;  %4870 = vmatprep.subr.bf16.mxu1 %v5468_v12 }
  0x3a   : > { %4878 = vmatpush3.bf16.msra.mxu1 %v5468_v12 }
  0x3b   : > { %4394 = vmatpush3.bf16.msra.mxu0 %v5157_v61  ;;  %4575 = vmatprep.subr.bf16.mxu1 %v5475_v13 }
  0x3c   : > { %4395 = vmatprep.subr.bf16.mxu0 %v5158_v63 }
  0x3e   : > { %4364 = vmatmul.mubr.bf16.gmra.mrb[12].mxu0 %v319_v37 }
  0x3f   : > { %4367 = vmatprep.mubr.bf16.mxu0 %v320_v38  ;;  %4396 = vmatpush3.bf16.msra.mxu0 %v5158_v63 }
  0x40   : > { %4397 = vmatprep.subr.bf16.mxu0 %v5159_v0 }
  0x43   : > { %4398 = vmatpush3.bf16.msra.mxu0 %v5159_v0 }
  0x44   : > { %4431 = vmatprep.subr.bf16.mxu0 %v5168_v10 }
  0x46   : > { %4368 = vmatmul.mubr.bf16.gmra.mrb[16].mxu0 %v321_v43 }
  0x47   : > { %4371 = vmatprep.mubr.bf16.mxu0 %v322_v44 }
  0x4e   : > { %4372 = vmatmul.mubr.bf16.gmra.mrb[20].mxu0 %v323_v49 }
  0x4f   : > { %4375 = vmatprep.mubr.bf16.mxu0 %v324_v50 }
  0x56   : > { %4376 = vmatmul.mubr.bf16.gmra.mrb[24].mxu0 %v325_v55 }
  0x57   : > { %4379 = vmatprep.mubr.bf16.mxu0 %v326_v56  ;;  %v5176_v56 = vld [vmem:[%s6136_s2 + $0x20] sm:$0xff]  }
  0x5e   : > { %4380 = vmatmul.mubr.bf16.gmra.mrb[28].mxu0 %v327_v59 }
  0x5f   : > { %4399 = vmatprep.mubr.bf16.mxu0 %v775_v3 }
  0xf9   : > { %v4353_v15 = vpop.f32.mrb[0].mxu0 }
  0xfa   : > { %v442_v16 = vadd.f32 %v4353_v15, %v5481_v14  ;;  %v433_v17 = vpop.f32.mrb[1].mxu0 }
  0xfb   : > { %v434_v18 = vadd.f32 %v5481_v14, %v433_v17  ;;  %v4354_v19 = vpop.f32.mrb[2].mxu0 }
  0xfc   : > { %v562_v20 = vmax.f32 %v442_v16, 0.0  ;;  %v445_v21 = vadd.f32 %v4354_v19, %v5481_v14  ;;  %v436_v22 = vpop.f32.mrb[3].mxu0 }
  0xfd   : > { %v560_v23 = vmax.f32 %v434_v18, 0.0  ;;  %v437_v24 = vadd.f32 %v5481_v14, %v436_v22  ;;  %v5180_v18 = vld [vmem:[%s6136_s2 + $0x30] sm:$0xff]  }
  0xfe   : > { %649 = vst [vmem:[#allocation2 + $0x31] sm:$0xff] %v562_v20  ;;  %v563_v25 = vmax.f32 %v445_v21, 0.0 }
  0xff   : > { %647 = vst [vmem:[#allocation2 + $0x19] sm:$0xff] %v560_v23  ;;  %v561_v26 = vmax.f32 %v437_v24, 0.0  ;;  %v5182_v24 = vld [vmem:[%s6136_s2 + $0x38] sm:$0xff]  }
 0x100   : > { %650 = vst [vmem:[#allocation2 + $0x39] sm:$0xff] %v563_v25  ;;  %v5487_v27 = vpack.c.bf16 %v563_v25, %v562_v20 }
 0x101   : > { %648 = vst [vmem:[#allocation2 + $0x21] sm:$0xff] %v561_v26  ;;  %v4357_v28 = vpop.f32.mrb[4].mxu0  ;;  %v5489_v29 = vpack.c.bf16 %v561_v26, %v560_v23 }
 0x102   : > { %v458_v31 = vadd.f32 %v4357_v28, %v5481_v14  ;;  %v449_v32 = vpop.f32.mrb[5].mxu0 }
 0x103   : > { %v450_v33 = vadd.f32 %v5481_v14, %v449_v32  ;;  %v4358_v34 = vpop.f32.mrb[6].mxu0  ;;  %4400 = vmatmul.mubr.bf16.vlgmr.msra.gmra.mrb[32].mxu0 %v5489_v29 }
 0x104   : > { %v566_v35 = vmax.f32 %v458_v31, 0.0  ;;  %v461_v36 = vadd.f32 %v4358_v34, %v5481_v14  ;;  %v452_v37 = vpop.f32.mrb[7].mxu0  ;;  %4403 = vmatprep.mubr.bf16.mxu0 %v5487_v27  ;;  %4432 = vmatpush3.bf16.msra.mxu0 %v5168_v10 }
 0x105   : > { %v564_v38 = vmax.f32 %v450_v33, 0.0  ;;  %v453_v39 = vadd.f32 %v5481_v14, %v452_v37  ;;  %4433 = vmatprep.subr.bf16.mxu0 %v5170_v30 }
 0x106   : > { %653 = vst [vmem:[#allocation2 + $0x61] sm:$0xff] %v566_v35  ;;  %v567_v41 = vmax.f32 %v461_v36, 0.0  ;;  %v5551_v36 = vld [vmem:[%s6136_s2 + $0x80] sm:$0xff]  }
 0x107   : > { %651 = vst [vmem:[#allocation2 + $0x49] sm:$0xff] %v564_v38  ;;  %v565_v42 = vmax.f32 %v453_v39, 0.0 }
 0x108   : > { %654 = vst [vmem:[#allocation2 + $0x69] sm:$0xff] %v567_v41  ;;  %v5503_v43 = vpack.c.bf16 %v567_v41, %v566_v35  ;;  %4434 = vmatpush3.bf16.msra.mxu0 %v5170_v30 }
 0x109   : > { %652 = vst [vmem:[#allocation2 + $0x51] sm:$0xff] %v565_v42  ;;  %v4361_v44 = vpop.f32.mrb[8].mxu0  ;;  %v5505_v45 = vpack.c.bf16 %v565_v42, %v564_v38  ;;  %4435 = vmatprep.subr.bf16.mxu0 %v5172_v40 }
 0x10a   : > { %v474_v47 = vadd.f32 %v4361_v44, %v5481_v14  ;;  %v465_v48 = vpop.f32.mrb[9].mxu0 }
 0x10b   : > { %v466_v49 = vadd.f32 %v5481_v14, %v465_v48  ;;  %v4362_v50 = vpop.f32.mrb[10].mxu0  ;;  %4404 = vmatmul.mubr.bf16.gmra.mrb[36].mxu0 %v5505_v45 }
 0x10c   : > { %v570_v51 = vmax.f32 %v474_v47, 0.0  ;;  %v477_v52 = vadd.f32 %v4362_v50, %v5481_v14  ;;  %v468_v53 = vpop.f32.mrb[11].mxu0  ;;  %4407 = vmatprep.mubr.bf16.mxu0 %v5503_v43  ;;  %4436 = vmatpush3.bf16.msra.mxu0 %v5172_v40 }
 0x10d   : > { %v568_v54 = vmax.f32 %v466_v49, 0.0  ;;  %v469_v55 = vadd.f32 %v5481_v14, %v468_v53  ;;  %4437 = vmatprep.subr.bf16.mxu0 %v5174_v46 }
 0x10e   : > { %657 = vst [vmem:[#allocation2 + $0x91] sm:$0xff] %v570_v51  ;;  %v571_v57 = vmax.f32 %v477_v52, 0.0 }
 0x10f   : > { %655 = vst [vmem:[#allocation2 + $0x79] sm:$0xff] %v568_v54  ;;  %v569_v58 = vmax.f32 %v469_v55, 0.0 }
 0x110   : > { %658 = vst [vmem:[#allocation2 + $0x99] sm:$0xff] %v571_v57  ;;  %v5519_v59 = vpack.c.bf16 %v571_v57, %v570_v51  ;;  %4438 = vmatpush3.bf16.msra.mxu0 %v5174_v46 }
 0x111   : > { %656 = vst [vmem:[#allocation2 + $0x81] sm:$0xff] %v569_v58  ;;  %v4365_v60 = vpop.f32.mrb[12].mxu0  ;;  %v5521_v61 = vpack.c.bf16 %v569_v58, %v568_v54  ;;  %4439 = vmatprep.subr.bf16.mxu0 %v5176_v56 }
 0x112   : > { %v490_v63 = vadd.f32 %v4365_v60, %v5481_v14  ;;  %v481_v0 = vpop.f32.mrb[13].mxu0 }
 0x113   : > { %v482_v1 = vadd.f32 %v5481_v14, %v481_v0  ;;  %v4366_v2 = vpop.f32.mrb[14].mxu0  ;;  %4408 = vmatmul.mubr.bf16.gmra.mrb[40].mxu0 %v5521_v61 }
 0x114   : > { %v574_v3 = vmax.f32 %v490_v63, 0.0  ;;  %v493_v10 = vadd.f32 %v4366_v2, %v5481_v14  ;;  %v484_v15 = vpop.f32.mrb[15].mxu0  ;;  %4411 = vmatprep.mubr.bf16.mxu0 %v5519_v59  ;;  %4440 = vmatpush3.bf16.msra.mxu0 %v5176_v56 }
 0x115   : > { %v572_v16 = vmax.f32 %v482_v1, 0.0  ;;  %v485_v17 = vadd.f32 %v5481_v14, %v484_v15  ;;  %4441 = vmatprep.subr.bf16.mxu0 %v5178_v62 }
 0x116   : > { %661 = vst [vmem:[#allocation2 + $0xc1] sm:$0xff] %v574_v3  ;;  %v575_v19 = vmax.f32 %v493_v10, 0.0  ;;  %v5171_v10 = vld [vmem:[%s6136_s2 + $0x108] sm:$0xff]  }
 0x117   : > { %659 = vst [vmem:[#allocation2 + $0xa9] sm:$0xff] %v572_v16  ;;  %v573_v20 = vmax.f32 %v485_v17, 0.0 }
 0x118   : > { %662 = vst [vmem:[#allocation2 + $0xc9] sm:$0xff] %v575_v19  ;;  %v5535_v21 = vpack.c.bf16 %v575_v19, %v574_v3  ;;  %4442 = vmatpush3.bf16.msra.mxu0 %v5178_v62 }
 0x119   : > { %660 = vst [vmem:[#allocation2 + $0xb1] sm:$0xff] %v573_v20  ;;  %v4369_v22 = vpop.f32.mrb[16].mxu0  ;;  %v5537_v23 = vpack.c.bf16 %v573_v20, %v572_v16  ;;  %4443 = vmatprep.subr.bf16.mxu0 %v5180_v18 }
 0x11a   : > { %v506_v25 = vadd.f32 %v4369_v22, %v5481_v14  ;;  %v497_v26 = vpop.f32.mrb[17].mxu0 }
 0x11b   : > { %v498_v28 = vadd.f32 %v5481_v14, %v497_v26  ;;  %v4370_v30 = vpop.f32.mrb[18].mxu0  ;;  %4412 = vmatmul.mubr.bf16.gmra.mrb[44].mxu0 %v5537_v23 }
 0x11c   : > { %v578_v31 = vmax.f32 %v506_v25, 0.0  ;;  %v509_v32 = vadd.f32 %v4370_v30, %v5481_v14  ;;  %v500_v33 = vpop.f32.mrb[19].mxu0  ;;  %4415 = vmatprep.mubr.bf16.mxu0 %v5535_v21  ;;  %4444 = vmatpush3.bf16.msra.mxu0 %v5180_v18  ;;  %v5173_v25 = vld [vmem:[%s6136_s2 + $0x110] sm:$0xff]  }
 0x11d   : > { %v576_v34 = vmax.f32 %v498_v28, 0.0  ;;  %v501_v35 = vadd.f32 %v5481_v14, %v500_v33  ;;  %4445 = vmatprep.subr.bf16.mxu0 %v5182_v24 }
 0x11e   : > { %665 = vst [vmem:[#allocation2 + $0xf1] sm:$0xff] %v578_v31  ;;  %v579_v37 = vmax.f32 %v509_v32, 0.0 }
 0x11f   : > { %663 = vst [vmem:[#allocation2 + $0xd9] sm:$0xff] %v576_v34  ;;  %v577_v38 = vmax.f32 %v501_v35, 0.0 }
 0x120   : > { %666 = vst [vmem:[#allocation2 + $0xf9] sm:$0xff] %v579_v37  ;;  %v5553_v39 = vpack.c.bf16 %v579_v37, %v578_v31  ;;  %4446 = vmatpush3.bf16.msra.mxu0 %v5182_v24 }
 0x121   : > { %664 = vst [vmem:[#allocation2 + $0xe1] sm:$0xff] %v577_v38  ;;  %v4373_v40 = vpop.f32.mrb[20].mxu0  ;;  %v5555_v41 = vpack.c.bf16 %v577_v38, %v576_v34  ;;  %4479 = vmatprep.subr.bf16.mxu0 %v5551_v36 }
 0x122   : > { %v522_v42 = vadd.f32 %v4373_v40, %v5481_v14  ;;  %v513_v44 = vpop.f32.mrb[21].mxu0 }
 0x123   : > { %v514_v46 = vadd.f32 %v5481_v14, %v513_v44  ;;  %v4374_v47 = vpop.f32.mrb[22].mxu0  ;;  %4416 = vmatmul.mubr.bf16.gmra.mrb[48].mxu0 %v5555_v41 }
 0x124   : > { %v582_v48 = vmax.f32 %v522_v42, 0.0  ;;  %v525_v49 = vadd.f32 %v4374_v47, %v5481_v14  ;;  %v516_v50 = vpop.f32.mrb[23].mxu0  ;;  %4419 = vmatprep.mubr.bf16.mxu0 %v5553_v39  ;;  %v5175_v42 = vld [vmem:[%s6136_s2 + $0x118] sm:$0xff]  }
 0x125   : > { %v580_v51 = vmax.f32 %v514_v46, 0.0  ;;  %v517_v52 = vadd.f32 %v5481_v14, %v516_v50  ;;  %v1550_v63 = vld [vmem:[#allocation2 + $0xf0] sm:$0xff] }
 0x126   : > { %669 = vst [vmem:[#allocation2 + $0x121] sm:$0xff] %v582_v48  ;;  %v583_v53 = vmax.f32 %v525_v49, 0.0  ;;  %v1548_v56 = vld [vmem:[#allocation2 + $0xd8] sm:$0xff] }
 0x127   : > { %667 = vst [vmem:[#allocation2 + $0x109] sm:$0xff] %v580_v51  ;;  %v581_v54 = vmax.f32 %v517_v52, 0.0  ;;  %v1551_v55 = vld [vmem:[#allocation2 + $0xf8] sm:$0xff] }
 0x128   : > { %670 = vst [vmem:[#allocation2 + $0x129] sm:$0xff] %v583_v53  ;;  %v1549_v57 = vld [vmem:[#allocation2 + $0xe0] sm:$0xff]  ;;  %v5564_v58 = vpack.c.bf16 %v583_v53, %v582_v48  ;;  %v5571_v3 = vpack.c.bf16 %v1551_v55, %v1550_v63 }
 0x129   : > { %668 = vst [vmem:[#allocation2 + $0x111] sm:$0xff] %v581_v54  ;;  %v4377_v60 = vpop.f32.mrb[24].mxu0  ;;  %v5566_v62 = vpack.c.bf16 %v1549_v57, %v1548_v56  ;;  %v5568_v0 = vpack.c.bf16 %v581_v54, %v580_v51  ;;  %v5177_v53 = vld [vmem:[%s6136_s2 + $0x120] sm:$0xff]  }
 0x12a   : > { %v538_v1 = vadd.f32 %v4377_v60, %v5481_v14  ;;  %v529_v2 = vpop.f32.mrb[25].mxu0 }
 0x12b   : > { %v530_v15 = vadd.f32 %v5481_v14, %v529_v2  ;;  %v4378_v16 = vpop.f32.mrb[26].mxu0  ;;  %4559 = vmatprep.mubr.bf16.mxu1 %v5566_v62  ;;  %4420 = vmatmul.mubr.bf16.gmra.mrb[52].mxu0 %v5568_v0 }
 0x12c   : > { %v586_v17 = vmax.f32 %v538_v1, 0.0  ;;  %v541_v18 = vadd.f32 %v4378_v16, %v5481_v14  ;;  %v532_v19 = vpop.f32.mrb[27].mxu0  ;;  %4560 = vmatmul.mubr.bf16.vlgmr.msra.gmra.mrb[0].mxu1 %v5571_v3  ;;  %4423 = vmatprep.mubr.bf16.mxu0 %v5564_v58  ;;  %v5181_v16 = vld [vmem:[%s6136_s2 + $0x130] sm:$0xff]  }
 0x12d   : > { %v584_v20 = vmax.f32 %v530_v15, 0.0  ;;  %v533_v22 = vadd.f32 %v5481_v14, %v532_v19  ;;  %4576 = vmatpush3.bf16.msra.mxu1 %v5475_v13  ;;  %v1554_v13 = vld [vmem:[#allocation2 + $0x120] sm:$0xff]  ;;  %v5274_v15 = vmov 0.0|0.0   ;;  %v684_v19 = vld [vmem:[#allocation2 + $0x38] sm:$0xff] }
 0x12e   : > { %673 = vst [vmem:[#allocation2 + $0x151] sm:$0xff] %v586_v17  ;;  %v587_v24 = vmax.f32 %v541_v18, 0.0  ;;  %4577 = vmatprep.subr.bf16.mxu1 %v5171_v10  ;;  %v1552_v30 = vld [vmem:[#allocation2 + $0x108] sm:$0xff] }
 0x12f   : > { %671 = vst [vmem:[#allocation2 + $0x139] sm:$0xff] %v584_v20  ;;  %v585_v26 = vmax.f32 %v533_v22, 0.0  ;;  %v1555_v28 = vld [vmem:[#allocation2 + $0x128] sm:$0xff] }
 0x130   : > { %674 = vst [vmem:[#allocation2 + $0x159] sm:$0xff] %v587_v24  ;;  %v1553_v31 = vld [vmem:[#allocation2 + $0x110] sm:$0xff]  ;;  %v5587_v32 = vpack.c.bf16 %v587_v24, %v586_v17  ;;  %v5594_v40 = vpack.c.bf16 %v1555_v28, %v1554_v13  ;;  %v682_v17 = vld [vmem:[#allocation2 + $0x20] sm:$0xff]  ;;  %v681_v24 = vld [vmem:[#allocation2 + $0x18] sm:$0xff] }
 0x131   : > { %672 = vst [vmem:[#allocation2 + $0x141] sm:$0xff] %v585_v26  ;;  %4578 = vmatpush3.bf16.msra.mxu1 %v5171_v10  ;;  %v4381_v33 = vpop.f32.mrb[28].mxu0  ;;  %v5589_v34 = vpack.c.bf16 %v1553_v31, %v1552_v30  ;;  %v5591_v35 = vpack.c.bf16 %v585_v26, %v584_v20  ;;  %v5179_v10 = vld [vmem:[%s6136_s2 + $0x128] sm:$0xff]   ;;  %v5628_v28 = vpack.c.bf16 %v682_v17, %v681_v24  ;;  %v683_v30 = vld [vmem:[#allocation2 + $0x30] sm:$0xff] }
 0x132   : > { %v554_v37 = vadd.f32 %v4381_v33, %v5481_v14  ;;  %v545_v38 = vpop.f32.mrb[29].mxu0  ;;  %4579 = vmatprep.subr.bf16.mxu1 %v5173_v25  ;;  %v5183_v33 = vld [vmem:[%s6136_s2 + $0x138] sm:$0xff]   ;;  %v5633_v13 = vpack.c.bf16 %v684_v19, %v683_v30  ;;  %v5197_v17 = vld [vmem:[%s6136_s2 + $0xb0] sm:$0xff]   ;;  %v695_v19 = vld [vmem:[#allocation2 + $0xc0] sm:$0xff] }
 0x133   : > { %v546_v44 = vadd.f32 %v5481_v14, %v545_v38  ;;  %v4382_v46 = vpop.f32.mrb[30].mxu0  ;;  %4563 = vmatprep.mubr.bf16.mxu1 %v5589_v34  ;;  %4424 = vmatmul.mubr.bf16.gmra.mrb[56].mxu0 %v5591_v35  ;;  %v5184_v38 = vld [vmem:[%s6136_s2 + $0x140] sm:$0xff]   ;;  %v5195_v24 = vld [vmem:[%s6136_s2 + $0x170] sm:$0xff]  }
 0x134   : > { %v590_v47 = vmax.f32 %v554_v37, 0.0  ;;  %v557_v48 = vadd.f32 %v4382_v46, %v5481_v14  ;;  %v548_v49 = vpop.f32.mrb[31].mxu0  ;;  %4564 = vmatmul.mubr.bf16.gmra.mrb[4].mxu1 %v5594_v40  ;;  %4427 = vmatprep.mubr.bf16.mxu0 %v5587_v32  ;;  %v5190_v37 = vld [vmem:[%s6136_s2 + $0x88] sm:$0xff]   ;;  %v5191_v46 = vld [vmem:[%s6136_s2 + $0x90] sm:$0xff]  }
 0x135   : > { %v588_v50 = vmax.f32 %v546_v44, 0.0  ;;  %v549_v51 = vadd.f32 %v5481_v14, %v548_v49  ;;  %4580 = vmatpush3.bf16.msra.mxu1 %v5173_v25  ;;  %v1558_v14 = vld [vmem:[#allocation2 + $0x150] sm:$0xff]  ;;  %v688_v44 = vld [vmem:[#allocation2 + $0x68] sm:$0xff]  ;;  %v687_v49 = vld [vmem:[#allocation2 + $0x60] sm:$0xff] }
 0x136   : > { %677 = vst [vmem:[#allocation2 + $0x181] sm:$0xff] %v590_v47  ;;  %v591_v52 = vmax.f32 %v557_v48, 0.0  ;;  %4581 = vmatprep.subr.bf16.mxu1 %v5175_v42  ;;  %v1556_v56 = vld [vmem:[#allocation2 + $0x138] sm:$0xff] }
 0x137   : > { %675 = vst [vmem:[#allocation2 + $0x169] sm:$0xff] %v588_v50  ;;  %v589_v54 = vmax.f32 %v549_v51, 0.0  ;;  %v1559_v55 = vld [vmem:[#allocation2 + $0x158] sm:$0xff]  ;;  %v690_v51 = vld [vmem:[#allocation2 + $0x80] sm:$0xff] }
 0x138   : > { %678 = vst [vmem:[#allocation2 + $0x189] sm:$0xff] %v591_v52  ;;  %v1557_v57 = vld [vmem:[#allocation2 + $0x140] sm:$0xff]  ;;  %v5609_v60 = vpack.c.bf16 %v591_v52, %v590_v47  ;;  %v5615_v2 = vpack.c.bf16 %v1559_v55, %v1558_v14  ;;  %v685_v47 = vld [vmem:[#allocation2 + $0x48] sm:$0xff]  ;;  %v5186_v52 = vld [vmem:[%s6136_s2 + $0x150] sm:$0xff]  }
 0x139   : > { %676 = vst [vmem:[#allocation2 + $0x171] sm:$0xff] %v589_v54  ;;  %4582 = vmatpush3.bf16.msra.mxu1 %v5175_v42  ;;  %v5611_v63 = vpack.c.bf16 %v1557_v57, %v1556_v56  ;;  %v5613_v1 = vpack.c.bf16 %v589_v54, %v588_v50  ;;  %v686_v42 = vld [vmem:[#allocation2 + $0x50] sm:$0xff]  ;;  %v5654_v50 = vpack.c.bf16 %v688_v44, %v687_v49  ;;  %v5194_v54 = vld [vmem:[%s6136_s2 + $0xa0] sm:$0xff]   ;;  %v689_v55 = vld [vmem:[#allocation2 + $0x78] sm:$0xff] }
 0x13a   : > { %4583 = vmatprep.subr.bf16.mxu1 %v5177_v53  ;;  %v5649_v48 = vpack.c.bf16 %v686_v42, %v685_v47  ;;  %v691_v56 = vld [vmem:[#allocation2 + $0x90] sm:$0xff]  ;;  %v5187_v57 = vld [vmem:[%s6136_s2 + $0x158] sm:$0xff]   ;;  %v5196_v14 = vld [vmem:[%s6136_s2 + $0xa8] sm:$0xff]  }
 0x13b   : > { %4567 = vmatprep.mubr.bf16.mxu1 %v5611_v63  ;;  %4428 = vmatmul.mubr.bf16.gmra.mrb[60].mxu0 %v5613_v1  ;;  %v1238_v30 = vld [vmem:[#allocation2 + $0x92] sm:$0xff]  ;;  %v5204_v44 = vld [vmem:[%s6136_s2 + $0x1a0] sm:$0xff]  }
 0x13c   : > { %4568 = vmatmul.mubr.bf16.gmra.mrb[8].mxu1 %v5615_v2  ;;  %4447 = vmatprep.mubr.bf16.mxu0 %v5274_v15  ;;  %v5189_v15 = vld [vmem:[%s6136_s2 + $0x160] sm:$0xff]   ;;  %v2157_v42 = vld [vmem:[#allocation2 + $0xb2] sm:$0xff] }
 0x13d   : > { %4584 = vmatpush3.bf16.msra.mxu1 %v5177_v53  ;;  %v1562_v26 = vld [vmem:[#allocation2 + $0x180] sm:$0xff]  ;;  %v692_v53 = vld [vmem:[#allocation2 + $0x98] sm:$0xff] }
 0x13e   : > { %4585 = vmatprep.subr.bf16.mxu1 %v5179_v10  ;;  %v1560_v20 = vld [vmem:[#allocation2 + $0x168] sm:$0xff] }
 0x13f   : > { %v1563_v18 = vld [vmem:[#allocation2 + $0x188] sm:$0xff] }
 0x140   : > { %v1561_v22 = vld [vmem:[#allocation2 + $0x170] sm:$0xff]  ;;  %v1579_v31 = vpack.c.bf16 %v1563_v18, %v1562_v26  ;;  %v693_v18 = vld [vmem:[#allocation2 + $0xa8] sm:$0xff]  ;;  %v5198_v26 = vld [vmem:[%s6136_s2 + $0x178] sm:$0xff]  }
 0x141   : > { %4586 = vmatpush3.bf16.msra.mxu1 %v5179_v10  ;;  %v5626_v25 = vpack.c.bf16 %v1561_v22, %v1560_v20  ;;  %v694_v10 = vld [vmem:[#allocation2 + $0xb0] sm:$0xff]  ;;  %v5192_v20 = vld [vmem:[%s6136_s2 + $0x168] sm:$0xff]   ;;  %v5199_v22 = vld [vmem:[%s6136_s2 + $0xb8] sm:$0xff]  }
 0x142   : > { %4587 = vmatprep.subr.bf16.mxu1 %v5181_v16 }
 0x143   : > { %4571 = vmatprep.mubr.bf16.mxu1 %v5626_v25  ;;  %4448 = vmatmul.mubr.bf16.vlgmr.msra.gmra.mrb[32].mxu0 %v5628_v28 }
 0x144   : > { %4572 = vmatmul.mubr.bf16.gmra.mrb[12].mxu1 %v1579_v31  ;;  %4451 = vmatprep.mubr.bf16.mxu0 %v5633_v13  ;;  %v1239_v31 = vld [vmem:[#allocation2 + $0x9a] sm:$0xff] }
 0x145   : > { %4588 = vmatpush3.bf16.msra.mxu1 %v5181_v16  ;;  %4591 = vmatprep.mubr.bf16.mxu1 %v5489_v29  ;;  %v5185_v29 = vld [vmem:[%s6136_s2 + $0x148] sm:$0xff]  }
 0x146   : > { %4589 = vmatprep.subr.bf16.mxu1 %v5183_v33  ;;  %4480 = vmatpush3.bf16.msra.mxu0 %v5551_v36  ;;  %v5193_v36 = vld [vmem:[%s6136_s2 + $0x98] sm:$0xff]   ;;  %v696_v16 = vld [vmem:[#allocation2 + $0xc8] sm:$0xff] }
 0x147   : > { %4481 = vmatprep.subr.bf16.mxu0 %v5190_v37 }
 0x149   : > { %4590 = vmatpush3.bf16.msra.mxu1 %v5183_v33 }
 0x14a   : > { %4623 = vmatprep.subr.bf16.mxu1 %v5184_v38  ;;  %4482 = vmatpush3.bf16.msra.mxu0 %v5190_v37  ;;  %v5754_v37 = vpack.c.bf16 %v1239_v31, %v1238_v30  ;;  %v2476_v30 = vld [vmem:[#allocation2 + $0x158] sm:$0xff] }
 0x14b   : > { %4452 = vmatmul.mubr.bf16.gmra.mrb[36].mxu0 %v5649_v48  ;;  %4483 = vmatprep.subr.bf16.mxu0 %v5191_v46  ;;  %v2473_v31 = vld [vmem:[#allocation2 + $0x138] sm:$0xff] }
 0x14c   : > { %4592 = vmatmul.mubr.bf16.vlgmr.msra.gmra.mrb[16].mxu1 %v5487_v27  ;;  %4455 = vmatprep.mubr.bf16.mxu0 %v5654_v50  ;;  %v5669_v27 = vpack.c.bf16 %v690_v51, %v689_v55  ;;  %v5206_v51 = vld [vmem:[%s6136_s2 + $0x1b0] sm:$0xff]   ;;  %v5207_v55 = vld [vmem:[%s6136_s2 + $0x1b8] sm:$0xff]  }
 0x14d   : > { %4624 = vmatpush3.bf16.msra.mxu1 %v5184_v38  ;;  %4595 = vmatprep.mubr.bf16.mxu1 %v5505_v45  ;;  %v5671_v45 = vpack.c.bf16 %v692_v53, %v691_v56  ;;  %v5203_v38 = vld [vmem:[%s6136_s2 + $0x198] sm:$0xff]  }
 0x14e   : > { %4625 = vmatprep.subr.bf16.mxu1 %v5185_v29  ;;  %4484 = vmatpush3.bf16.msra.mxu0 %v5191_v46  ;;  %v1243_v46 = vld [vmem:[#allocation2 + $0xca] sm:$0xff]  ;;  %v2165_v56 = vld [vmem:[#allocation2 + $0x112] sm:$0xff] }
 0x14f   : > { %4485 = vmatprep.subr.bf16.mxu0 %v5193_v36 }
 0x151   : > { %4626 = vmatpush3.bf16.msra.mxu1 %v5185_v29  ;;  %v5205_v29 = vld [vmem:[%s6136_s2 + $0x1a8] sm:$0xff]  }
 0x152   : > { %4627 = vmatprep.subr.bf16.mxu1 %v5186_v52  ;;  %4486 = vmatpush3.bf16.msra.mxu0 %v5193_v36  ;;  %v2161_v36 = vld [vmem:[#allocation2 + $0xe2] sm:$0xff] }
 0x153   : > { %4456 = vmatmul.mubr.bf16.gmra.mrb[40].mxu0 %v5669_v27  ;;  %4487 = vmatprep.subr.bf16.mxu0 %v5194_v54 }
 0x154   : > { %4596 = vmatmul.mubr.bf16.gmra.mrb[20].mxu1 %v5503_v43  ;;  %4459 = vmatprep.mubr.bf16.mxu0 %v5671_v45  ;;  %v5689_v43 = vpack.c.bf16 %v694_v10, %v693_v18  ;;  %v1251_v10 = vld [vmem:[#allocation2 + $0x12a] sm:$0xff]  ;;  %v1254_v18 = vld [vmem:[#allocation2 + $0x152] sm:$0xff] }
 0x155   : > { %4599 = vmatprep.mubr.bf16.mxu1 %v5521_v61  ;;  %4628 = vmatpush3.bf16.msra.mxu1 %v5186_v52  ;;  %v5691_v61 = vpack.c.bf16 %v696_v16, %v695_v19  ;;  %v1247_v52 = vld [vmem:[#allocation2 + $0xfa] sm:$0xff] }
 0x156   : > { %4629 = vmatprep.subr.bf16.mxu1 %v5187_v57  ;;  %4488 = vmatpush3.bf16.msra.mxu0 %v5194_v54  ;;  %v2168_v16 = vld [vmem:[#allocation2 + $0x13a] sm:$0xff] }
 0x157   : > { %4489 = vmatprep.subr.bf16.mxu0 %v5196_v14  ;;  %v1255_v19 = vld [vmem:[#allocation2 + $0x15a] sm:$0xff] }
 0x159   : > { %4630 = vmatpush3.bf16.msra.mxu1 %v5187_v57  ;;  %v5208_v57 = vld [vmem:[%s6136_s2 + $0x1c0] sm:$0xff]  }
 0x15a   : > { %4631 = vmatprep.subr.bf16.mxu1 %v5189_v15  ;;  %4490 = vmatpush3.bf16.msra.mxu0 %v5196_v14  ;;  %v1250_v14 = vld [vmem:[#allocation2 + $0x122] sm:$0xff] }
 0x15b   : > { %4460 = vmatmul.mubr.bf16.gmra.mrb[44].mxu0 %v5689_v43  ;;  %4491 = vmatprep.subr.bf16.mxu0 %v5197_v17 }
 0x15c   : > { %4600 = vmatmul.mubr.bf16.gmra.mrb[24].mxu1 %v5519_v59  ;;  %4463 = vmatprep.mubr.bf16.mxu0 %v5691_v61  ;;  %v5200_v59 = vld [vmem:[%s6136_s2 + $0x180] sm:$0xff]  }
 0x15d   : > { %4603 = vmatprep.mubr.bf16.mxu1 %v5537_v23  ;;  %4632 = vmatpush3.bf16.msra.mxu1 %v5189_v15  ;;  %v1227_v23 = vld [vmem:[#allocation2 + $0xa] sm:$0xff] }
 0x15e   : > { %4633 = vmatprep.subr.bf16.mxu1 %v5192_v20  ;;  %4492 = vmatpush3.bf16.msra.mxu0 %v5197_v17  ;;  %v2169_v17 = vld [vmem:[#allocation2 + $0x142] sm:$0xff] }
 0x15f   : > { %4493 = vmatprep.subr.bf16.mxu0 %v5199_v22 }
 0x161   : > { %4634 = vmatpush3.bf16.msra.mxu1 %v5192_v20  ;;  %v5811_v20 = vpack.c.bf16 %v2169_v17, %v2168_v16  ;;  %v2761_v16 = vld [vmem:[#allocation2 + $0x61] sm:$0xff] }
 0x162   : > { %4635 = vmatprep.subr.bf16.mxu1 %v5195_v24  ;;  %4494 = vmatpush3.bf16.msra.mxu0 %v5199_v22  ;;  %v5813_v22 = vpack.c.bf16 %v1255_v19, %v1254_v18  ;;  %v5217_v17 = vld [vmem:[%s6136_s2 + $0x208] sm:$0xff]   ;;  %v5218_v19 = vld [vmem:[%s6136_s2 + $0x210] sm:$0xff]  }
 0x163   : > { %4464 = vmatmul.mubr.bf16.gmra.mrb[48].mxu0 %v5566_v62  ;;  %4527 = vmatprep.subr.bf16.mxu0 %v5416_v4  ;;  %v2145_v62 = vld [vmem:[#allocation2 + $0x22] sm:$0xff] }
 0x164   : > { %4604 = vmatmul.mubr.bf16.gmra.mrb[28].mxu1 %v5535_v21  ;;  %4467 = vmatprep.mubr.bf16.mxu0 %v5571_v3  ;;  %v1226_v21 = vld [vmem:[#allocation2 + $0x2] sm:$0xff]  ;;  %v1231_v3 = vld [vmem:[#allocation2 + $0x3a] sm:$0xff] }
 0x165   : > { %4607 = vmatprep.mubr.bf16.mxu1 %v5555_v41  ;;  %4636 = vmatpush3.bf16.msra.mxu1 %v5195_v24  ;;  %v1258_v41 = vpack.c.bf16 %v1227_v23, %v1226_v21  ;;  %v2172_v24 = vld [vmem:[#allocation2 + $0x16a] sm:$0xff]  ;;  %v2174_v21 = vld [vmem:[#allocation2 + $0x182] sm:$0xff] }
 0x166   : > { %4637 = vmatprep.subr.bf16.mxu1 %v5198_v26  ;;  %v2175_v23 = vld [vmem:[#allocation2 + $0x18a] sm:$0xff] }
 0x169   : > { %4638 = vmatpush3.bf16.msra.mxu1 %v5198_v26  ;;  %v2173_v26 = vld [vmem:[#allocation2 + $0x172] sm:$0xff] }
 0x16a   : > { %4671 = vmatprep.subr.bf16.mxu1 %v5200_v59 }
 0x16b   : > { %4468 = vmatmul.mubr.bf16.gmra.mrb[52].mxu0 %v5589_v34 }
 0x16c   : > { %4608 = vmatmul.mubr.bf16.gmra.mrb[0].mxu1 %v5553_v39  ;;  %4471 = vmatprep.mubr.bf16.mxu0 %v5594_v40  ;;  %v2144_v39 = vld [vmem:[#allocation2 + $0x1a] sm:$0xff]  ;;  %v1234_v40 = vld [vmem:[#allocation2 + $0x62] sm:$0xff] }
 0x16d   : > { %4611 = vmatprep.mubr.bf16.mxu1 %v5568_v0  ;;  %v1230_v0 = vld [vmem:[#allocation2 + $0x32] sm:$0xff]  ;;  %v2176_v34 = vpack.c.bf16 %v2145_v62, %v2144_v39  ;;  %v5209_v39 = vld [vmem:[%s6136_s2 + $0x1c8] sm:$0xff]  }
 0x16e   : > { %v2468_v62 = vld [vmem:[#allocation2 + $0xf8] sm:$0xff] }
 0x173   : > { %4472 = vmatmul.mubr.bf16.gmra.mrb[56].mxu0 %v5611_v63  ;;  %v1235_v63 = vld [vmem:[#allocation2 + $0x6a] sm:$0xff] }
 0x174   : > { %4612 = vmatmul.mubr.bf16.gmra.mrb[4].mxu1 %v5564_v58  ;;  %4475 = vmatprep.mubr.bf16.mxu0 %v5615_v2  ;;  %v5728_v58 = vpack.c.bf16 %v1231_v3, %v1230_v0  ;;  %v5201_v2 = vld [vmem:[%s6136_s2 + $0x188] sm:$0xff]   ;;  %v2465_v0 = vld [vmem:[#allocation2 + $0xd8] sm:$0xff] }
 0x175   : > { %4615 = vmatprep.mubr.bf16.mxu1 %v5591_v35  ;;  %v2148_v35 = vld [vmem:[#allocation2 + $0x4a] sm:$0xff] }
 0x17b   : > { %4476 = vmatmul.mubr.bf16.gmra.mrb[60].mxu0 %v5626_v25  ;;  %v5202_v25 = vld [vmem:[%s6136_s2 + $0x190] sm:$0xff]  }
 0x17c   : > { %4616 = vmatmul.mubr.bf16.gmra.mrb[8].mxu1 %v5587_v32  ;;  %4495 = vmatprep.mubr.bf16.mxu0 %v1258_v41  ;;  %v2149_v32 = vld [vmem:[#allocation2 + $0x52] sm:$0xff]  ;;  %v5825_v41 = vpack.c.bf16 %v2175_v23, %v2174_v21 }
 0x17d   : > { %4619 = vmatprep.mubr.bf16.mxu1 %v5613_v1  ;;  %v5734_v1 = vpack.c.bf16 %v2149_v32, %v2148_v35  ;;  %v5215_v35 = vld [vmem:[%s6136_s2 + $0x1f8] sm:$0xff]   ;;  %v2470_v32 = vld [vmem:[#allocation2 + $0x110] sm:$0xff] }
 0x17e   : > { %v2763_v21 = vld [vmem:[#allocation2 + $0x79] sm:$0xff] }
 0x183   : > { %4496 = vmatmul.mubr.bf16.vlgmr.msra.gmra.mrb[32].mxu0 %v2176_v34 }
 0x184   : > { %4620 = vmatmul.mubr.bf16.gmra.mrb[12].mxu1 %v5609_v60  ;;  %4499 = vmatprep.mubr.bf16.mxu0 %v5728_v58  ;;  %v5740_v60 = vpack.c.bf16 %v1235_v63, %v1234_v40  ;;  %v2472_v40 = vld [vmem:[#allocation2 + $0x128] sm:$0xff] }
 0x185   : > { %4639 = vmatprep.mubr.bf16.mxu1 %v2176_v34  ;;  %4528 = vmatpush3.bf16.msra.mxu0 %v5416_v4  ;;  %v2152_v4 = vld [vmem:[#allocation2 + $0x7a] sm:$0xff]  ;;  %v2467_v34 = vld [vmem:[#allocation2 + $0xf0] sm:$0xff]  ;;  %v2469_v63 = vld [vmem:[#allocation2 + $0x108] sm:$0xff] }
 0x186   : > { %4529 = vmatprep.subr.bf16.mxu0 %v5423_v5 }
 0x189   : > { %4530 = vmatpush3.bf16.msra.mxu0 %v5423_v5  ;;  %v2153_v5 = vld [vmem:[#allocation2 + $0x82] sm:$0xff] }
 0x18a   : > { %4531 = vmatprep.subr.bf16.mxu0 %v5430_v6  ;;  %v5752_v33 = vpack.c.bf16 %v2153_v5, %v2152_v4  ;;  %v2471_v4 = vld [vmem:[#allocation2 + $0x120] sm:$0xff] }
 0x18b   : > { %4500 = vmatmul.mubr.bf16.gmra.mrb[36].mxu0 %v5734_v1  ;;  %v2493_v5 = vpack.c.bf16 %v2472_v40, %v2471_v4 }
 0x18c   : > { %4640 = vmatmul.mubr.bf16.vlgmr.msra.gmra.mrb[16].mxu1 %v5728_v58  ;;  %4503 = vmatprep.mubr.bf16.mxu0 %v5740_v60 }
 0x18d   : > { %4672 = vmatpush3.bf16.msra.mxu1 %v5200_v59  ;;  %4643 = vmatprep.mubr.bf16.mxu1 %v5734_v1  ;;  %v5819_v59 = vpack.c.bf16 %v2173_v26, %v2172_v24  ;;  %v2764_v24 = vld [vmem:[#allocation2 + $0x81] sm:$0xff]  ;;  %v2766_v26 = vld [vmem:[#allocation2 + $0x99] sm:$0xff] }
 0x18e   : > { %4673 = vmatprep.subr.bf16.mxu1 %v5201_v2  ;;  %4532 = vmatpush3.bf16.msra.mxu0 %v5430_v6  ;;  %v2156_v6 = vld [vmem:[#allocation2 + $0xaa] sm:$0xff]  ;;  %v2792_v23 = vpack.c.bf16 %v2764_v24, %v2763_v21 }
 0x18f   : > { %4533 = vmatprep.subr.bf16.mxu0 %v5437_v7  ;;  %v5770_v47 = vpack.c.bf16 %v2157_v42, %v2156_v6  ;;  %v2475_v6 = vld [vmem:[#allocation2 + $0x150] sm:$0xff] }
 0x190   : > { %v2495_v42 = vpack.c.bf16 %v2476_v30, %v2475_v6  ;;  %v2775_v30 = vld [vmem:[#allocation2 + $0x109] sm:$0xff] }
 0x191   : > { %4674 = vmatpush3.bf16.msra.mxu1 %v5201_v2  ;;  %v2492_v2 = vpack.c.bf16 %v2470_v32, %v2469_v63  ;;  %v2771_v32 = vld [vmem:[#allocation2 + $0xd9] sm:$0xff]  ;;  %v2773_v63 = vld [vmem:[#allocation2 + $0xf1] sm:$0xff] }
 0x192   : > { %4675 = vmatprep.subr.bf16.mxu1 %v5202_v25  ;;  %4534 = vmatpush3.bf16.msra.mxu0 %v5437_v7  ;;  %v1242_v7 = vld [vmem:[#allocation2 + $0xc2] sm:$0xff] }
 0x193   : > { %4504 = vmatmul.mubr.bf16.gmra.mrb[40].mxu0 %v5752_v33  ;;  %4535 = vmatprep.subr.bf16.mxu0 %v5444_v8  ;;  %v5772_v49 = vpack.c.bf16 %v1243_v46, %v1242_v7  ;;  %v2480_v7 = vld [vmem:[#allocation2 + $0x188] sm:$0xff] }
 0x194   : > { %4644 = vmatmul.mubr.bf16.gmra.mrb[20].mxu1 %v5740_v60  ;;  %4507 = vmatprep.mubr.bf16.mxu0 %v5754_v37  ;;  %v2477_v46 = vld [vmem:[#allocation2 + $0x168] sm:$0xff] }
 0x195   : > { %4647 = vmatprep.mubr.bf16.mxu1 %v5752_v33  ;;  %4676 = vmatpush3.bf16.msra.mxu1 %v5202_v25  ;;  %v2474_v25 = vld [vmem:[#allocation2 + $0x140] sm:$0xff] }
 0x196   : > { %4677 = vmatprep.subr.bf16.mxu1 %v5203_v38  ;;  %4536 = vmatpush3.bf16.msra.mxu0 %v5444_v8  ;;  %v2160_v8 = vld [vmem:[#allocation2 + $0xda] sm:$0xff] }
 0x197   : > { %4537 = vmatprep.subr.bf16.mxu0 %v5451_v9  ;;  %v5788_v53 = vpack.c.bf16 %v2161_v36, %v2160_v8  ;;  %v2479_v8 = vld [vmem:[#allocation2 + $0x180] sm:$0xff] }
 0x198   : > { %v2497_v36 = vpack.c.bf16 %v2480_v7, %v2479_v8  ;;  %v2779_v7 = vld [vmem:[#allocation2 + $0x139] sm:$0xff] }
 0x199   : > { %4678 = vmatpush3.bf16.msra.mxu1 %v5203_v38  ;;  %v2494_v38 = vpack.c.bf16 %v2474_v25, %v2473_v31  ;;  %v2778_v25 = vld [vmem:[#allocation2 + $0x129] sm:$0xff] }
 0x19a   : > { %4679 = vmatprep.subr.bf16.mxu1 %v5204_v44  ;;  %4538 = vmatpush3.bf16.msra.mxu0 %v5451_v9  ;;  %v1246_v9 = vld [vmem:[#allocation2 + $0xf2] sm:$0xff] }
 0x19b   : > { %4508 = vmatmul.mubr.bf16.gmra.mrb[44].mxu0 %v5770_v47  ;;  %4539 = vmatprep.subr.bf16.mxu0 %v5461_v11  ;;  %v5790_v54 = vpack.c.bf16 %v1247_v52, %v1246_v9  ;;  %v2758_v52 = vld [vmem:[#allocation2 + $0x39] sm:$0xff] }
 0x19c   : > { %4648 = vmatmul.mubr.bf16.gmra.mrb[24].mxu1 %v5754_v37  ;;  %4511 = vmatprep.mubr.bf16.mxu0 %v5772_v49 }
 0x19d   : > { %4651 = vmatprep.mubr.bf16.mxu1 %v5770_v47  ;;  %4680 = vmatpush3.bf16.msra.mxu1 %v5204_v44  ;;  %v2478_v44 = vld [vmem:[#allocation2 + $0x170] sm:$0xff] }
 0x19e   : > { %4681 = vmatprep.subr.bf16.mxu1 %v5205_v29  ;;  %4540 = vmatpush3.bf16.msra.mxu0 %v5461_v11  ;;  %v2164_v11 = vld [vmem:[#allocation2 + $0x10a] sm:$0xff] }
 0x19f   : > { %4541 = vmatprep.subr.bf16.mxu0 %v5468_v12  ;;  %v5803_v15 = vpack.c.bf16 %v2165_v56, %v2164_v11  ;;  %v2760_v56 = vld [vmem:[#allocation2 + $0x51] sm:$0xff] }
 0x1a1   : > { %4682 = vmatpush3.bf16.msra.mxu1 %v5205_v29  ;;  %v2496_v29 = vpack.c.bf16 %v2478_v44, %v2477_v46  ;;  %v2782_v44 = vld [vmem:[#allocation2 + $0x159] sm:$0xff] }
 0x1a2   : > { %4683 = vmatprep.subr.bf16.mxu1 %v5206_v51  ;;  %4542 = vmatpush3.bf16.msra.mxu0 %v5468_v12  ;;  %v5805_v12 = vpack.c.bf16 %v1251_v10, %v1250_v14  ;;  %v2759_v14 = vld [vmem:[#allocation2 + $0x49] sm:$0xff]  ;;  %v5224_v46 = vld [vmem:[%s6137_s3] sm:$0xff]  }
 0x1a3   : > { %4512 = vmatmul.mubr.bf16.gmra.mrb[48].mxu0 %v5788_v53  ;;  %v2790_v10 = vpack.c.bf16 %v2760_v56, %v2759_v14  ;;  %4815 = vmatprep.subr.bf16.mxu0 %v5224_v46  ;;  %v5227_v56 = vld [vmem:[%s6137_s3 + $0x18] sm:$0xff]   ;;  %v2785_v14 = vld [vmem:[#allocation2 + $0x181] sm:$0xff] }
 0x1a4   : > { %4652 = vmatmul.mubr.bf16.gmra.mrb[28].mxu1 %v5772_v49  ;;  %4515 = vmatprep.mubr.bf16.mxu0 %v5790_v54 }
 0x1a5   : > { %4655 = vmatprep.mubr.bf16.mxu1 %v5788_v53  ;;  %4684 = vmatpush3.bf16.msra.mxu1 %v5206_v51  ;;  %v5232_v51 = vld [vmem:[#allocation2] sm:$0xff] }
 0x1a6   : > { %4685 = vmatprep.subr.bf16.mxu1 %v5207_v55  ;;  %v2498_v9 = vpack.c.bf16 %v5232_v51, %v5232_v51 }
 0x1a9   : > { %4686 = vmatpush3.bf16.msra.mxu1 %v5207_v55  ;;  %v2757_v55 = vld [vmem:[#allocation2 + $0x31] sm:$0xff] }
 0x1aa   : > { %4719 = vmatprep.subr.bf16.mxu1 %v5208_v57  ;;  %v2789_v11 = vpack.c.bf16 %v2758_v52, %v2757_v55  ;;  %v2784_v52 = vld [vmem:[#allocation2 + $0x171] sm:$0xff]  ;;  %v2786_v55 = vld [vmem:[#allocation2 + $0x189] sm:$0xff] }
 0x1ab   : > { %4516 = vmatmul.mubr.bf16.gmra.mrb[52].mxu0 %v5803_v15 }
 0x1ac   : > { %4656 = vmatmul.mubr.bf16.gmra.mrb[0].mxu1 %v5790_v54  ;;  %4519 = vmatprep.mubr.bf16.mxu0 %v5805_v12 }
 0x1ad   : > { %4659 = vmatprep.mubr.bf16.mxu1 %v5803_v15 }
 0x1b3   : > { %4520 = vmatmul.mubr.bf16.gmra.mrb[56].mxu0 %v5811_v20 }
 0x1b4   : > { %4660 = vmatmul.mubr.bf16.gmra.mrb[4].mxu1 %v5805_v12  ;;  %4523 = vmatprep.mubr.bf16.mxu0 %v5813_v22 }
 0x1b5   : > { %4663 = vmatprep.mubr.bf16.mxu1 %v5811_v20 }
 0x1bb   : > { %4524 = vmatmul.mubr.bf16.gmra.mrb[60].mxu0 %v5819_v59 }
 0x1bc   : > { %4664 = vmatmul.mubr.bf16.gmra.mrb[8].mxu1 %v5813_v22  ;;  %4543 = vmatprep.mubr.bf16.mxu0 %v5628_v28  ;;  %v5210_v28 = vld [vmem:[%s6136_s2 + $0x1d0] sm:$0xff]  }
 0x1bd   : > { %4667 = vmatprep.mubr.bf16.mxu1 %v5819_v59 }
 0x1c3   : > { %4544 = vmatmul.mubr.bf16.vlgmr.msra.gmra.mrb[32].mxu0 %v5633_v13 }
 0x1c4   : > { %4668 = vmatmul.mubr.bf16.gmra.mrb[12].mxu1 %v5825_v41  ;;  %4547 = vmatprep.mubr.bf16.mxu0 %v5649_v48 }
 0x1c5   : > { %4687 = vmatprep.mubr.bf16.mxu1 %v5633_v13  ;;  %v5211_v13 = vld [vmem:[%s6136_s2 + $0x1d8] sm:$0xff]   ;;  %4816 = vmatpush3.bf16.msra.mxu0 %v5224_v46 }
 0x1cb   : > { %4548 = vmatmul.mubr.bf16.gmra.mrb[36].mxu0 %v5654_v50 }
 0x1cc   : > { %4688 = vmatmul.mubr.bf16.vlgmr.msra.gmra.mrb[16].mxu1 %v5649_v48  ;;  %4551 = vmatprep.mubr.bf16.mxu0 %v5669_v27  ;;  %v5212_v48 = vld [vmem:[%s6136_s2 + $0x1e0] sm:$0xff]  }
 0x1cd   : > { %4720 = vmatpush3.bf16.msra.mxu1 %v5208_v57  ;;  %4691 = vmatprep.mubr.bf16.mxu1 %v5654_v50  ;;  %v5213_v50 = vld [vmem:[%s6136_s2 + $0x1e8] sm:$0xff]  }
 0x1ce   : > { %4721 = vmatprep.subr.bf16.mxu1 %v5209_v39  ;;  %v2762_v57 = vld [vmem:[#allocation2 + $0x69] sm:$0xff] }
 0x1cf   : > { %v2791_v18 = vpack.c.bf16 %v2762_v57, %v2761_v16  ;;  %v2787_v16 = vld [vmem:[#allocation2 + $0x199] sm:$0xff] }
 0x1d1   : > { %4722 = vmatpush3.bf16.msra.mxu1 %v5209_v39  ;;  %v2765_v39 = vld [vmem:[#allocation2 + $0x91] sm:$0xff] }
 0x1d2   : > { %4723 = vmatprep.subr.bf16.mxu1 %v5210_v28 }
 0x1d3   : > { %4552 = vmatmul.mubr.bf16.gmra.mrb[40].mxu0 %v5671_v45 }
 0x1d4   : > { %4692 = vmatmul.mubr.bf16.gmra.mrb[20].mxu1 %v5669_v27  ;;  %4555 = vmatprep.mubr.bf16.mxu0 %v5689_v43  ;;  %v5214_v27 = vld [vmem:[%s6136_s2 + $0x1f0] sm:$0xff]  }
 0x1d5   : > { %4695 = vmatprep.mubr.bf16.mxu1 %v5671_v45  ;;  %4724 = vmatpush3.bf16.msra.mxu1 %v5210_v28  ;;  %v2466_v45 = vld [vmem:[#allocation2 + $0xe0] sm:$0xff]  ;;  %v5219_v28 = vld [vmem:[%s6136_s2 + $0x218] sm:$0xff]  }
 0x1d6   : > { %4725 = vmatprep.subr.bf16.mxu1 %v5211_v13  ;;  %v2490_v3 = vpack.c.bf16 %v2466_v45, %v2465_v0  ;;  %v2767_v45 = vld [vmem:[#allocation2 + $0xa9] sm:$0xff]  ;;  %v2769_v0 = vld [vmem:[#allocation2 + $0xc1] sm:$0xff] }
 0x1d9   : > { %4726 = vmatpush3.bf16.msra.mxu1 %v5211_v13  ;;  %v2793_v13 = vpack.c.bf16 %v2766_v26, %v2765_v39 }
 0x1da   : > { %4727 = vmatprep.subr.bf16.mxu1 %v5212_v48 }
 0x1db   : > { %4556 = vmatmul.mubr.bf16.gmra.mrb[44].mxu0 %v5691_v61 }
 0x1dc   : > { %4696 = vmatmul.mubr.bf16.gmra.mrb[24].mxu1 %v5689_v43  ;;  %v2491_v43 = vpack.c.bf16 %v2468_v62, %v2467_v34 }
 0x1dd   : > { %4699 = vmatprep.mubr.bf16.mxu1 %v5691_v61  ;;  %4728 = vmatpush3.bf16.msra.mxu1 %v5212_v48  ;;  %v5216_v61 = vld [vmem:[%s6136_s2 + $0x200] sm:$0xff]  }
 0x1de   : > { %4729 = vmatprep.subr.bf16.mxu1 %v5213_v50  ;;  %v5220_v48 = vld [vmem:[%s6136_s2 + $0x220] sm:$0xff]  }
 0x1e1   : > { %4730 = vmatpush3.bf16.msra.mxu1 %v5213_v50  ;;  %v2768_v50 = vld [vmem:[#allocation2 + $0xb1] sm:$0xff] }
 0x1e2   : > { %4731 = vmatprep.subr.bf16.mxu1 %v5214_v27  ;;  %v2794_v62 = vpack.c.bf16 %v2768_v50, %v2767_v45 }
 0x1e4   : > { %4700 = vmatmul.mubr.bf16.gmra.mrb[28].mxu1 %v2490_v3  ;;  %v5221_v3 = vld [vmem:[%s6136_s2 + $0x228] sm:$0xff]  }
 0x1e5   : > { %4703 = vmatprep.mubr.bf16.mxu1 %v2491_v43  ;;  %4732 = vmatpush3.bf16.msra.mxu1 %v5214_v27  ;;  %v2770_v27 = vld [vmem:[#allocation2 + $0xc9] sm:$0xff]  ;;  %v2772_v43 = vld [vmem:[#allocation2 + $0xe1] sm:$0xff] }
 0x1e6   : > { %4733 = vmatprep.subr.bf16.mxu1 %v5215_v35  ;;  %v2795_v34 = vpack.c.bf16 %v2770_v27, %v2769_v0  ;;  %v2796_v40 = vpack.c.bf16 %v2772_v43, %v2771_v32  ;;  %v5229_v0 = vld [vmem:[%s6137_s3 + $0x28] sm:$0xff]   ;;  %v5231_v32 = vld [vmem:[%s6137_s3 + $0x38] sm:$0xff]  }
 0x1e9   : > { %4734 = vmatpush3.bf16.msra.mxu1 %v5215_v35  ;;  %v5222_v35 = vld [vmem:[%s6136_s2 + $0x230] sm:$0xff]  }
 0x1ea   : > { %4767 = vmatprep.subr.bf16.mxu1 %v5216_v61 }
 0x1ec   : > { %4704 = vmatmul.mubr.bf16.gmra.mrb[0].mxu1 %v2492_v2  ;;  %v5223_v2 = vld [vmem:[%s6136_s2 + $0x238] sm:$0xff]  }
 0x1ed   : > { %4707 = vmatprep.mubr.bf16.mxu1 %v2493_v5  ;;  %v2776_v5 = vld [vmem:[#allocation2 + $0x111] sm:$0xff] }
 0x1ee   : > { %v2798_v31 = vpack.c.bf16 %v2776_v5, %v2775_v30 }
 0x1f4   : > { %4708 = vmatmul.mubr.bf16.gmra.mrb[4].mxu1 %v2494_v38  ;;  %v2777_v38 = vld [vmem:[#allocation2 + $0x121] sm:$0xff] }
 0x1f5   : > { %4711 = vmatprep.mubr.bf16.mxu1 %v2495_v42  ;;  %v2799_v6 = vpack.c.bf16 %v2778_v25, %v2777_v38  ;;  %v2780_v42 = vld [vmem:[#allocation2 + $0x141] sm:$0xff]  ;;  %v5969_v25 = vld [vmem:[%s6139_s5] ss:$0 sm:$0xff] }
 0x1f6   : > { %v2800_v8 = vpack.c.bf16 %v2780_v42, %v2779_v7 }
 0x1fc   : > { %4712 = vmatmul.mubr.bf16.gmra.mrb[8].mxu1 %v2496_v29  ;;  %v5225_v29 = vld [vmem:[%s6137_s3 + $0x8] sm:$0xff]  }
 0x1fd   : > { %4715 = vmatprep.mubr.bf16.mxu1 %v2497_v36  ;;  %v2781_v36 = vld [vmem:[#allocation2 + $0x151] sm:$0xff]  ;;  %4817 = vmatprep.subr.bf16.mxu0 %v5225_v29 }
 0x1fe   : > { %v2801_v51 = vpack.c.bf16 %v2782_v44, %v2781_v36  ;;  %4818 = vmatpush3.bf16.msra.mxu0 %v5225_v29 }
 0x204   : > { %4716 = vmatmul.mubr.bf16.gmra.mrb[12].mxu1 %v2498_v9  ;;  %v5226_v9 = vld [vmem:[%s6137_s3 + $0x10] sm:$0xff]  }
 0x205   : > { %4735 = vmatprep.mubr.bf16.mxu1 %v2789_v11  ;;  %v2783_v11 = vld [vmem:[#allocation2 + $0x169] sm:$0xff]  ;;  %4819 = vmatprep.subr.bf16.mxu0 %v5226_v9 }
 0x206   : > { %v2802_v57 = vpack.c.bf16 %v2784_v52, %v2783_v11  ;;  %4820 = vmatpush3.bf16.msra.mxu0 %v5226_v9 }
 0x207   : > { %4821 = vmatprep.subr.bf16.mxu0 %v5227_v56 }
 0x20a   : > { %4822 = vmatpush3.bf16.msra.mxu0 %v5227_v56 }
 0x20c   : > { %4736 = vmatmul.mubr.bf16.vlgmr.msra.gmra.mrb[16].mxu1 %v2790_v10  ;;  %v2803_v10 = vpack.c.bf16 %v2786_v55, %v2785_v14 }
 0x20d   : > { %4768 = vmatpush3.bf16.msra.mxu1 %v5216_v61  ;;  %4739 = vmatprep.mubr.bf16.mxu1 %v2791_v18  ;;  %v2774_v61 = vld [vmem:[#allocation2 + $0xf9] sm:$0xff] }
 0x20e   : > { %4769 = vmatprep.subr.bf16.mxu1 %v5217_v17  ;;  %v2797_v4 = vpack.c.bf16 %v2774_v61, %v2773_v63  ;;  %v5228_v18 = vld [vmem:[%s6137_s3 + $0x20] sm:$0xff]  }
 0x20f   : > { %4823 = vmatprep.subr.bf16.mxu0 %v5228_v18 }
 0x210   : > { %4824 = vmatpush3.bf16.msra.mxu0 %v5228_v18 }
 0x211   : > { %4770 = vmatpush3.bf16.msra.mxu1 %v5217_v17  ;;  %v2788_v17 = vld [vmem:[#allocation2 + $0x1a1] sm:$0xff]  ;;  %4825 = vmatprep.subr.bf16.mxu0 %v5229_v0 }
 0x212   : > { %4771 = vmatprep.subr.bf16.mxu1 %v5218_v19 }
 0x214   : > { %4740 = vmatmul.mubr.bf16.gmra.mrb[20].mxu1 %v2792_v23  ;;  %4826 = vmatpush3.bf16.msra.mxu0 %v5229_v0 }
 0x215   : > { %4743 = vmatprep.mubr.bf16.mxu1 %v2793_v13  ;;  %4772 = vmatpush3.bf16.msra.mxu1 %v5218_v19  ;;  %v2804_v19 = vpack.c.bf16 %v2788_v17, %v2787_v16 }
 0x216   : > { %4773 = vmatprep.subr.bf16.mxu1 %v5219_v28 }
 0x219   : > { %4774 = vmatpush3.bf16.msra.mxu1 %v5219_v28 }
 0x21a   : > { %4775 = vmatprep.subr.bf16.mxu1 %v5220_v48 }
 0x21c   : > { %4744 = vmatmul.mubr.bf16.gmra.mrb[24].mxu1 %v2794_v62 }
 0x21d   : > { %4747 = vmatprep.mubr.bf16.mxu1 %v2795_v34  ;;  %4776 = vmatpush3.bf16.msra.mxu1 %v5220_v48 }
 0x21e   : > { %4777 = vmatprep.subr.bf16.mxu1 %v5221_v3 }
 0x221   : > { %4778 = vmatpush3.bf16.msra.mxu1 %v5221_v3 }
 0x222   : > { %4779 = vmatprep.subr.bf16.mxu1 %v5222_v35 }
 0x224   : > { %4748 = vmatmul.mubr.bf16.gmra.mrb[28].mxu1 %v2796_v40 }
 0x225   : > { %4751 = vmatprep.mubr.bf16.mxu1 %v2797_v4  ;;  %4780 = vmatpush3.bf16.msra.mxu1 %v5222_v35  ;;  %v5230_v35 = vld [vmem:[%s6137_s3 + $0x30] sm:$0xff]  }
 0x226   : > { %4781 = vmatprep.subr.bf16.mxu1 %v5223_v2  ;;  %4827 = vmatprep.subr.bf16.mxu0 %v5230_v35 }
 0x227   : > { %4828 = vmatpush3.bf16.msra.mxu0 %v5230_v35 }
 0x228   : > { %4829 = vmatprep.subr.bf16.mxu0 %v5231_v32 }
 0x229   : > { %4782 = vmatpush3.bf16.msra.mxu1 %v5223_v2 }
 0x22b   : > { %4830 = vmatpush3.bf16.msra.mxu0 %v5231_v32 }
 0x22c   : > { %4752 = vmatmul.mubr.bf16.gmra.mrb[0].mxu1 %v2798_v31 }
 0x22d   : > { %4755 = vmatprep.mubr.bf16.mxu1 %v2799_v6 }
 0x234   : > { %4756 = vmatmul.mubr.bf16.gmra.mrb[4].mxu1 %v2800_v8 }
 0x235   : > { %4759 = vmatprep.mubr.bf16.mxu1 %v2801_v51 }
 0x23c   : > { %4760 = vmatmul.mubr.bf16.gmra.mrb[8].mxu1 %v2802_v57 }
 0x23d   : > { %4763 = vmatprep.mubr.bf16.mxu1 %v2803_v10 }
 0x244   : > { %4764 = vmatmul.mubr.bf16.gmra.mrb[12].mxu1 %v2804_v19 }
 0x245   : > { %4783 = vmatprep.mubr.bf16.mxu1 %v5728_v58 }
 0x24c   : > { %4784 = vmatmul.mubr.bf16.vlgmr.msra.gmra.mrb[16].mxu1 %v5734_v1 }
 0x24d   : > { %4787 = vmatprep.mubr.bf16.mxu1 %v5740_v60 }
 0x254   : > { %4788 = vmatmul.mubr.bf16.gmra.mrb[20].mxu1 %v5752_v33 }
 0x255   : > { %4791 = vmatprep.mubr.bf16.mxu1 %v5754_v37  ;;  %v3093_v37 = vld [vmem:[#allocation2 + $0x19a] sm:$0xff] }
 0x25c   : > { %4792 = vmatmul.mubr.bf16.gmra.mrb[24].mxu1 %v5770_v47  ;;  %v3094_v47 = vld [vmem:[#allocation2 + $0x1a2] sm:$0xff] }
 0x25d   : > { %4795 = vmatprep.mubr.bf16.mxu1 %v5772_v49 }
 0x264   : > { %4796 = vmatmul.mubr.bf16.gmra.mrb[28].mxu1 %v5788_v53 }
 0x265   : > { %4799 = vmatprep.mubr.bf16.mxu1 %v5790_v54  ;;  %v3110_v54 = vpack.c.bf16 %v3094_v47, %v3093_v37 }
 0x26c   : > { %4800 = vmatmul.mubr.bf16.gmra.mrb[0].mxu1 %v5803_v15 }
 0x26d   : > { %4803 = vmatprep.mubr.bf16.mxu1 %v5805_v12 }
 0x274   : > { %4804 = vmatmul.mubr.bf16.gmra.mrb[4].mxu1 %v5811_v20 }
 0x275   : > { %4807 = vmatprep.mubr.bf16.mxu1 %v5813_v22 }
 0x276   : > { %v5915_v58 = vpop.f32.mrb[48].mxu0 }
 0x277   : > { %v5917_v1 = vpop.f32.mrb[49].mxu0 }
 0x278   : > { %v5919_v60 = vpop.f32.mrb[50].mxu0 }
 0x279   : > { %v5921_v33 = vpop.f32.mrb[51].mxu0 }
 0x27c   : > { %4808 = vmatmul.mubr.bf16.gmra.mrb[8].mxu1 %v5819_v59 }
 0x27d   : > { %4811 = vmatprep.mubr.bf16.mxu1 %v5825_v41 }
 0x27e   : > { %v5925_v49 = vpop.f32.mrb[52].mxu0 }
 0x27f   : > { %v5927_v53 = vpop.f32.mrb[53].mxu0 }
 0x280   : > { %v5929_v15 = vpop.f32.mrb[54].mxu0 }
 0x281   : > { %v5931_v12 = vpop.f32.mrb[55].mxu0 }
 0x284   : > { %4812 = vmatmul.mubr.bf16.gmra.mrb[12].mxu1 %v3110_v54 }
 0x286   : > { %v5933_v20 = vpop.f32.mrb[56].mxu0 }
 0x287   : > { %v5935_v22 = vpop.f32.mrb[57].mxu0 }
 0x288   : > { %v5937_v24 = vpop.f32.mrb[58].mxu0 }
 0x289   : > { %v5939_v59 = vpop.f32.mrb[59].mxu0 }
 0x28e   : > { %v5941_v41 = vpop.f32.mrb[60].mxu0 }
 0x28f   : > { %v5943_v26 = vpop.f32.mrb[61].mxu0 }
 0x290   : > { %v5945_v21 = vpop.f32.mrb[62].mxu0 }
 0x291   : > { %v5947_v23 = vpop.f32.mrb[63].mxu0 }
 0x296   : > { %v4545_v39 = vpop.f32.mrb[32].mxu0 }
 0x297   : > { %v1679_v28 = vpop.f32.mrb[33].mxu0 }
 0x298   : > { %v4546_v13 = vpop.f32.mrb[34].mxu0 }
 0x299   : > { %v1682_v48 = vpop.f32.mrb[35].mxu0 }
 0x29e   : > { %v4549_v50 = vpop.f32.mrb[36].mxu0 }
 0x29f   : > { %v1695_v27 = vpop.f32.mrb[37].mxu0 }
 0x2a0   : > { %v4550_v45 = vpop.f32.mrb[38].mxu0 }
 0x2a1   : > { %v1698_v62 = vpop.f32.mrb[39].mxu0 }
 0x2a6   : > { %v4553_v3 = vpop.f32.mrb[40].mxu0 }
 0x2a7   : > { %v1711_v34 = vpop.f32.mrb[41].mxu0 }
 0x2a8   : > { %v4554_v43 = vpop.f32.mrb[42].mxu0 }
 0x2a9   : > { %v1714_v61 = vpop.f32.mrb[43].mxu0 }
 0x2ae   : > { %v5958_v40 = vpop.f32.mrb[44].mxu0 }
 0x2af   : > { %v5960_v63 = vpop.f32.mrb[45].mxu0 }
 0x2b0   : > { %v5962_v2 = vpop.f32.mrb[46].mxu0 }
 0x2b1   : > { %v5964_v4 = vpop.f32.mrb[47].mxu0 }
 0x31f   : > { %v4785_v5 = vpop.f32.mrb[16].mxu1 }
 0x320   : > { %v4879_v30 = vadd.f32 %v4785_v5, %v4545_v39  ;;  %v3210_v31 = vpop.f32.mrb[17].mxu1 }
 0x321   : > { %v4880_v38 = vadd.f32 %v3210_v31, %v1679_v28  ;;  %v4786_v6 = vpop.f32.mrb[18].mxu1 }
 0x322   : > { %v3378_v42 = vadd.f32 %v4879_v30, %v5969_v25  ;;  %v4881_v44 = vadd.f32 %v4786_v6, %v4546_v13  ;;  %v3213_v7 = vpop.f32.mrb[19].mxu1 }
 0x323   : > { %v3376_v46 = vadd.f32 %v4880_v38, %v5969_v25  ;;  %v4882_v29 = vadd.f32 %v3213_v7, %v1682_v48 }
 0x324   : > { %v3379_v8 = vadd.f32 %v4881_v44, %v5969_v25  ;;  %v3410_v51 = vmax.f32 %v3378_v42, 0.0 }
 0x325   : > { %v3377_v36 = vadd.f32 %v4882_v29, %v5969_v25  ;;  %v3408_v52 = vmax.f32 %v3376_v46, 0.0 }
 0x326   : > { %v3411_v9 = vmax.f32 %v3379_v8, 0.0 }
 0x327   : > { %v3409_v55 = vmax.f32 %v3377_v36, 0.0  ;;  %v4789_v11 = vpop.f32.mrb[20].mxu1 }
 0x328   : > { %v3441_v56 = vpack.c.bf16 %v3411_v9, %v3410_v51  ;;  %v4883_v57 = vadd.f32 %v4789_v11, %v4549_v50  ;;  %v3226_v14 = vpop.f32.mrb[21].mxu1 }
 0x329   : > { %v4884_v10 = vadd.f32 %v3226_v14, %v1695_v27  ;;  %v4790_v16 = vpop.f32.mrb[22].mxu1  ;;  %v3440_v17 = vpack.c.bf16 %v3409_v55, %v3408_v52 }
 0x32a   : > { %v3382_v18 = vadd.f32 %v4883_v57, %v5969_v25  ;;  %v4885_v19 = vadd.f32 %v4790_v16, %v4550_v45  ;;  %v3229_v37 = vpop.f32.mrb[23].mxu1 }
 0x32b   : > { %v3380_v47 = vadd.f32 %v4884_v10, %v5969_v25  ;;  %v4886_v54 = vadd.f32 %v3229_v37, %v1698_v62  ;;  %4831 = vmatprep.mubr.bf16.mxu0 %v3440_v17 }
 0x32c   : > { %v3383_v39 = vadd.f32 %v4885_v19, %v5969_v25  ;;  %4832 = vmatmul.mubr.bf16.vlgmr.msra.gmra.mrb[64].mxu0 %v3441_v56  ;;  %v3414_v13 = vmax.f32 %v3382_v18, 0.0 }
 0x32d   : > { %v3381_v28 = vadd.f32 %v4886_v54, %v5969_v25  ;;  %v3412_v50 = vmax.f32 %v3380_v47, 0.0 }
 0x32e   : > { %v3415_v48 = vmax.f32 %v3383_v39, 0.0 }
 0x32f   : > { %v3413_v0 = vmax.f32 %v3381_v28, 0.0  ;;  %v4793_v27 = vpop.f32.mrb[24].mxu1 }
 0x330   : > { %v4887_v35 = vadd.f32 %v4793_v27, %v4553_v3  ;;  %v3242_v32 = vpop.f32.mrb[25].mxu1  ;;  %v3443_v5 = vpack.c.bf16 %v3415_v48, %v3414_v13 }
 0x331   : > { %v4888_v30 = vadd.f32 %v3242_v32, %v1711_v34  ;;  %v4794_v45 = vpop.f32.mrb[26].mxu1  ;;  %v3442_v31 = vpack.c.bf16 %v3413_v0, %v3412_v50 }
 0x332   : > { %v3386_v38 = vadd.f32 %v4887_v35, %v5969_v25  ;;  %v4889_v62 = vadd.f32 %v4794_v45, %v4554_v43  ;;  %v3245_v6 = vpop.f32.mrb[27].mxu1 }
 0x333   : > { %v3384_v42 = vadd.f32 %v4888_v30, %v5969_v25  ;;  %v4890_v44 = vadd.f32 %v3245_v6, %v1714_v61  ;;  %4835 = vmatprep.mubr.bf16.mxu0 %v3442_v31 }
 0x334   : > { %v3387_v7 = vadd.f32 %v4889_v62, %v5969_v25  ;;  %4836 = vmatmul.mubr.bf16.gmra.mrb[68].mxu0 %v3443_v5  ;;  %v3418_v29 = vmax.f32 %v3386_v38, 0.0 }
 0x335   : > { %v3385_v46 = vadd.f32 %v4890_v44, %v5969_v25  ;;  %v3416_v8 = vmax.f32 %v3384_v42, 0.0 }
 0x336   : > { %v3419_v3 = vmax.f32 %v3387_v7, 0.0 }
 0x337   : > { %v3417_v36 = vmax.f32 %v3385_v46, 0.0  ;;  %v4797_v34 = vpop.f32.mrb[28].mxu1 }
 0x338   : > { %v4891_v51 = vadd.f32 %v4797_v34, %v5958_v40  ;;  %v3258_v9 = vpop.f32.mrb[29].mxu1  ;;  %v3445_v52 = vpack.c.bf16 %v3419_v3, %v3418_v29 }
 0x339   : > { %v4892_v43 = vadd.f32 %v3258_v9, %v5960_v63  ;;  %v4798_v55 = vpop.f32.mrb[30].mxu1  ;;  %v3444_v11 = vpack.c.bf16 %v3417_v36, %v3416_v8 }
 0x33a   : > { %v3390_v61 = vadd.f32 %v4891_v51, %v5969_v25  ;;  %v4893_v56 = vadd.f32 %v4798_v55, %v5962_v2  ;;  %v3261_v57 = vpop.f32.mrb[31].mxu1 }
 0x33b   : > { %v3388_v14 = vadd.f32 %v4892_v43, %v5969_v25  ;;  %v4894_v10 = vadd.f32 %v3261_v57, %v5964_v4  ;;  %4839 = vmatprep.mubr.bf16.mxu0 %v3444_v11 }
 0x33c   : > { %v3391_v16 = vadd.f32 %v4893_v56, %v5969_v25  ;;  %4840 = vmatmul.mubr.bf16.gmra.mrb[72].mxu0 %v3445_v52  ;;  %v3422_v17 = vmax.f32 %v3390_v61, 0.0 }
 0x33d   : > { %v3389_v40 = vadd.f32 %v4894_v10, %v5969_v25  ;;  %v3420_v63 = vmax.f32 %v3388_v14, 0.0 }
 0x33e   : > { %v3423_v18 = vmax.f32 %v3391_v16, 0.0 }
 0x33f   : > { %v3421_v19 = vmax.f32 %v3389_v40, 0.0  ;;  %v4801_v37 = vpop.f32.mrb[0].mxu1 }
 0x340   : > { %v4895_v47 = vadd.f32 %v4801_v37, %v5915_v58  ;;  %v3274_v54 = vpop.f32.mrb[1].mxu1  ;;  %v3447_v2 = vpack.c.bf16 %v3423_v18, %v3422_v17 }
 0x341   : > { %v4896_v39 = vadd.f32 %v3274_v54, %v5917_v1  ;;  %v4802_v28 = vpop.f32.mrb[2].mxu1  ;;  %v3446_v13 = vpack.c.bf16 %v3421_v19, %v3420_v63 }
 0x342   : > { %v3394_v4 = vadd.f32 %v4895_v47, %v5969_v25  ;;  %v4897_v48 = vadd.f32 %v4802_v28, %v5919_v60  ;;  %v3277_v50 = vpop.f32.mrb[3].mxu1 }
 0x343   : > { %v3392_v0 = vadd.f32 %v4896_v39, %v5969_v25  ;;  %v4898_v27 = vadd.f32 %v3277_v50, %v5921_v33  ;;  %4843 = vmatprep.mubr.bf16.mxu0 %v3446_v13 }
 0x344   : > { %v3395_v35 = vadd.f32 %v4897_v48, %v5969_v25  ;;  %4844 = vmatmul.mubr.bf16.gmra.mrb[76].mxu0 %v3447_v2  ;;  %v3426_v32 = vmax.f32 %v3394_v4, 0.0 }
 0x345   : > { %v3393_v58 = vadd.f32 %v4898_v27, %v5969_v25  ;;  %v3424_v1 = vmax.f32 %v3392_v0, 0.0 }
 0x346   : > { %v3427_v5 = vmax.f32 %v3395_v35, 0.0 }
 0x347   : > { %v3425_v30 = vmax.f32 %v3393_v58, 0.0  ;;  %v4805_v45 = vpop.f32.mrb[4].mxu1 }
 0x348   : > { %v4899_v31 = vadd.f32 %v4805_v45, %v5925_v49  ;;  %v3290_v38 = vpop.f32.mrb[5].mxu1  ;;  %v3449_v60 = vpack.c.bf16 %v3427_v5, %v3426_v32 }
 0x349   : > { %v4900_v62 = vadd.f32 %v3290_v38, %v5927_v53  ;;  %v4806_v6 = vpop.f32.mrb[6].mxu1  ;;  %v3448_v42 = vpack.c.bf16 %v3425_v30, %v3424_v1  ;;  %v5233_v1 = vld [vmem:[%s5340_s12 + $0x10] sm:$0xff]  ;;  %v5234_v38 = vld [vmem:[%s5340_s12] sm:$0xff] }
 0x34a   : > { %v3398_v33 = vadd.f32 %v4899_v31, %v5969_v25  ;;  %v4901_v44 = vadd.f32 %v4806_v6, %v5929_v15  ;;  %v3293_v7 = vpop.f32.mrb[7].mxu1 }
 0x34b   : > { %v3396_v46 = vadd.f32 %v4900_v62, %v5969_v25  ;;  %v4902_v29 = vadd.f32 %v3293_v7, %v5931_v12  ;;  %4847 = vmatprep.mubr.bf16.mxu0 %v3448_v42  ;;  %v5235_v42 = vld [vmem:[%s5340_s12 + $0x18] sm:$0xff]  ;;  %v5236_v7 = vld [vmem:[%s5340_s12 + $0x8] sm:$0xff] }
 0x34c   : > { %v3399_v3 = vadd.f32 %v4901_v44, %v5969_v25  ;;  %4848 = vmatmul.mubr.bf16.gmra.mrb[80].mxu0 %v3449_v60  ;;  %v3430_v8 = vmax.f32 %v3398_v33, 0.0 }
 0x34d   : > { %v3397_v49 = vadd.f32 %v4902_v29, %v5969_v25  ;;  %v3428_v53 = vmax.f32 %v3396_v46, 0.0 }
 0x34e   : > { %v3431_v36 = vmax.f32 %v3399_v3, 0.0 }
 0x34f   : > { %v3429_v34 = vmax.f32 %v3397_v49, 0.0  ;;  %v4809_v51 = vpop.f32.mrb[8].mxu1 }
 0x350   : > { %v4903_v9 = vadd.f32 %v4809_v51, %v5933_v20  ;;  %v3306_v52 = vpop.f32.mrb[9].mxu1  ;;  %v3451_v15 = vpack.c.bf16 %v3431_v36, %v3430_v8  ;;  %v5237_v51 = vld [vmem:[%s5340_s12 + $0x30] sm:$0xff] }
 0x351   : > { %v4904_v43 = vadd.f32 %v3306_v52, %v5935_v22  ;;  %v4810_v55 = vpop.f32.mrb[10].mxu1  ;;  %v3450_v11 = vpack.c.bf16 %v3429_v34, %v3428_v53 }
 0x352   : > { %v3402_v12 = vadd.f32 %v4903_v9, %v5969_v25  ;;  %v4905_v61 = vadd.f32 %v4810_v55, %v5937_v24  ;;  %v3309_v56 = vpop.f32.mrb[11].mxu1 }
 0x353   : > { %v3400_v57 = vadd.f32 %v4904_v43, %v5969_v25  ;;  %v4906_v14 = vadd.f32 %v3309_v56, %v5939_v59  ;;  %4851 = vmatprep.mubr.bf16.mxu0 %v3450_v11  ;;  %v5238_v43 = vld [vmem:[%s5340_s12 + $0x20] sm:$0xff] }
 0x354   : > { %v3403_v10 = vadd.f32 %v4905_v61, %v5969_v25  ;;  %4852 = vmatmul.mubr.bf16.gmra.mrb[84].mxu0 %v3451_v15  ;;  %v3434_v16 = vmax.f32 %v3402_v12, 0.0  ;;  %v5239_v61 = vld [vmem:[%s5340_s12 + $0x38] sm:$0xff] }
 0x355   : > { %v3401_v20 = vadd.f32 %v4906_v14, %v5969_v25  ;;  %v3432_v22 = vmax.f32 %v3400_v57, 0.0  ;;  %v5240_v14 = vld [vmem:[%s5340_s12 + $0x28] sm:$0xff] }
 0x356   : > { %v3435_v40 = vmax.f32 %v3403_v10, 0.0 }
 0x357   : > { %v3433_v17 = vmax.f32 %v3401_v20, 0.0  ;;  %v4813_v18 = vpop.f32.mrb[12].mxu1 }
 0x358   : > { %v4907_v63 = vadd.f32 %v4813_v18, %v5941_v41  ;;  %v3322_v19 = vpop.f32.mrb[13].mxu1  ;;  %v3453_v24 = vpack.c.bf16 %v3435_v40, %v3434_v16 }
 0x359   : > { %v4908_v37 = vadd.f32 %v3322_v19, %v5943_v26  ;;  %v4814_v47 = vpop.f32.mrb[14].mxu1  ;;  %v3452_v54 = vpack.c.bf16 %v3433_v17, %v3432_v22  ;;  %v5241_v19 = vld [vmem:[%s5340_s12 + $0x50] sm:$0xff] }
 0x35a   : > { %v3406_v59 = vadd.f32 %v4907_v63, %v5969_v25  ;;  %v4909_v2 = vadd.f32 %v4814_v47, %v5945_v21  ;;  %v3325_v39 = vpop.f32.mrb[15].mxu1 }
 0x35b   : > { %v3404_v28 = vadd.f32 %v4908_v37, %v5969_v25  ;;  %v4910_v13 = vadd.f32 %v3325_v39, %v5947_v23  ;;  %4855 = vmatprep.mubr.bf16.mxu0 %v3452_v54  ;;  %v6026_v23 = vld [vmem:[%s6140_s6] ss:$0 sm:$0xff] }
 0x35c   : > { %v3407_v4 = vadd.f32 %v4909_v2, %v5969_v25  ;;  %4856 = vmatmul.mubr.bf16.gmra.mrb[88].mxu0 %v3453_v24  ;;  %v3438_v48 = vmax.f32 %v3406_v59, 0.0  ;;  %v5242_v54 = vld [vmem:[%s5340_s12 + $0x40] sm:$0xff] }
 0x35d   : > { %v3405_v41 = vadd.f32 %v4910_v13, %v5969_v25  ;;  %v3436_v50 = vmax.f32 %v3404_v28, 0.0  ;;  %v5243_v28 = vld [vmem:[%s5340_s12 + $0x58] sm:$0xff] }
 0x35e   : > { %v3439_v26 = vmax.f32 %v3407_v4, 0.0 }
 0x35f   : > { %v3437_v0 = vmax.f32 %v3405_v41, 0.0  ;;  %v5244_v41 = vld [vmem:[%s5340_s12 + $0x48] sm:$0xff] }
 0x360   : > { %v3455_v27 = vpack.c.bf16 %v3439_v26, %v3438_v48 }
 0x361   : > { %v3454_v21 = vpack.c.bf16 %v3437_v0, %v3436_v50 }
 0x363   : > { %4859 = vmatprep.mubr.bf16.mxu0 %v3454_v21 }
 0x364   : > { %4860 = vmatmul.mubr.bf16.gmra.mrb[92].mxu0 %v3455_v27 }
 0x3ff   : > { %v4833_v35 = vpop.f32.mrb[64].mxu0 }
 0x400   : > { %v3570_v58 = vadd.f32 %v4833_v35, %v6026_v23  ;;  %v3561_v25 = vpop.f32.mrb[65].mxu0 }
 0x401   : > { %v3562_v32 = vadd.f32 %v6026_v23, %v3561_v25  ;;  %v4834_v5 = vpop.f32.mrb[66].mxu0  ;;  %v5245_v25 = vld [vmem:[%s5340_s12 + $0x70] sm:$0xff] }
 0x402   : > { %v3690_v30 = vadd.f32 %v5233_v1, %v3570_v58  ;;  %v3573_v45 = vadd.f32 %v4834_v5, %v6026_v23  ;;  %v3564_v31 = vpop.f32.mrb[67].mxu0 }
 0x403   : > { %v3688_v60 = vadd.f32 %v5234_v38, %v3562_v32  ;;  %v3565_v62 = vadd.f32 %v6026_v23, %v3564_v31 }
 0x404   : > { %v3722_v6 = vmax.f32 %v3690_v30, 0.0  ;;  %v3691_v33 = vadd.f32 %v5235_v42, %v3573_v45  ;;  %v5246_v30 = vld [vmem:[%s5340_s12 + $0x60] sm:$0xff]  ;;  %v5248_v42 = vld [vmem:[%s5340_s12 + $0x68] sm:$0xff] }
 0x405   : > { %v3720_v44 = vmax.f32 %v3688_v60, 0.0  ;;  %v3689_v46 = vadd.f32 %v5236_v7, %v3565_v62  ;;  %v5247_v60 = vld [vmem:[%s5340_s12 + $0x78] sm:$0xff] }
 0x406   : > { %3754 = vst [vmem:[%s6037_s20 + $0x10] sm:$0xff] %v3722_v6  ;;  %v3723_v29 = vmax.f32 %v3691_v33, 0.0 }
 0x407   : > { %3752 = vst [vmem:[%s6037_s20] sm:$0xff] %v3720_v44  ;;  %v3721_v3 = vmax.f32 %v3689_v46, 0.0  ;;  %v4837_v49 = vpop.f32.mrb[68].mxu0 }
 0x408   : > { %3755 = vst [vmem:[%s6037_s20 + $0x18] sm:$0xff] %v3723_v29  ;;  %v3586_v8 = vadd.f32 %v4837_v49, %v6026_v23  ;;  %v3577_v36 = vpop.f32.mrb[69].mxu0 }
 0x409   : > { %3753 = vst [vmem:[%s6037_s20 + $0x8] sm:$0xff] %v3721_v3  ;;  %v3578_v53 = vadd.f32 %v6026_v23, %v3577_v36  ;;  %v4838_v34 = vpop.f32.mrb[70].mxu0  ;;  %v5249_v36 = vld [vmem:[%s5340_s12 + $0x90] sm:$0xff] }
 0x40a   : > { %v3694_v9 = vadd.f32 %v5237_v51, %v3586_v8  ;;  %v3589_v52 = vadd.f32 %v4838_v34, %v6026_v23  ;;  %v3580_v15 = vpop.f32.mrb[71].mxu0 }
 0x40b   : > { %v3692_v55 = vadd.f32 %v5238_v43, %v3578_v53  ;;  %v3581_v11 = vadd.f32 %v6026_v23, %v3580_v15 }
 0x40c   : > { %v3726_v12 = vmax.f32 %v3694_v9, 0.0  ;;  %v3695_v56 = vadd.f32 %v5239_v61, %v3589_v52  ;;  %v5250_v9 = vld [vmem:[%s5340_s12 + $0x80] sm:$0xff]  ;;  %v5252_v61 = vld [vmem:[%s5340_s12 + $0x88] sm:$0xff] }
 0x40d   : > { %v3724_v57 = vmax.f32 %v3692_v55, 0.0  ;;  %v3693_v10 = vadd.f32 %v5240_v14, %v3581_v11  ;;  %v5251_v55 = vld [vmem:[%s5340_s12 + $0x98] sm:$0xff] }
 0x40e   : > { %3758 = vst [vmem:[%s6037_s20 + $0x30] sm:$0xff] %v3726_v12  ;;  %v3727_v20 = vmax.f32 %v3695_v56, 0.0 }
 0x40f   : > { %3756 = vst [vmem:[%s6037_s20 + $0x20] sm:$0xff] %v3724_v57  ;;  %v3725_v16 = vmax.f32 %v3693_v10, 0.0  ;;  %v4841_v40 = vpop.f32.mrb[72].mxu0 }
 0x410   : > { %3759 = vst [vmem:[%s6037_s20 + $0x38] sm:$0xff] %v3727_v20  ;;  %v3602_v22 = vadd.f32 %v4841_v40, %v6026_v23  ;;  %v3593_v17 = vpop.f32.mrb[73].mxu0 }
 0x411   : > { %3757 = vst [vmem:[%s6037_s20 + $0x28] sm:$0xff] %v3725_v16  ;;  %v3594_v18 = vadd.f32 %v6026_v23, %v3593_v17  ;;  %v4842_v63 = vpop.f32.mrb[74].mxu0  ;;  %v5253_v17 = vld [vmem:[%s5340_s12 + $0xb0] sm:$0xff] }
 0x412   : > { %v3698_v24 = vadd.f32 %v5241_v19, %v3602_v22  ;;  %v3605_v37 = vadd.f32 %v4842_v63, %v6026_v23  ;;  %v3596_v47 = vpop.f32.mrb[75].mxu0 }
 0x413   : > { %v3696_v59 = vadd.f32 %v5242_v54, %v3594_v18  ;;  %v3597_v2 = vadd.f32 %v6026_v23, %v3596_v47 }
 0x414   : > { %v3730_v39 = vmax.f32 %v3698_v24, 0.0  ;;  %v3699_v13 = vadd.f32 %v5243_v28, %v3605_v37  ;;  %v5254_v24 = vld [vmem:[%s5340_s12 + $0xa0] sm:$0xff]  ;;  %v5256_v28 = vld [vmem:[%s5340_s12 + $0xa8] sm:$0xff] }
 0x415   : > { %v3728_v4 = vmax.f32 %v3696_v59, 0.0  ;;  %v3697_v48 = vadd.f32 %v5244_v41, %v3597_v2  ;;  %v5255_v59 = vld [vmem:[%s5340_s12 + $0xb8] sm:$0xff] }
 0x416   : > { %3762 = vst [vmem:[%s6037_s20 + $0x50] sm:$0xff] %v3730_v39  ;;  %v3731_v26 = vmax.f32 %v3699_v13, 0.0 }
 0x417   : > { %3760 = vst [vmem:[%s6037_s20 + $0x40] sm:$0xff] %v3728_v4  ;;  %v3729_v50 = vmax.f32 %v3697_v48, 0.0  ;;  %v4845_v0 = vpop.f32.mrb[76].mxu0 }
 0x418   : > { %3763 = vst [vmem:[%s6037_s20 + $0x58] sm:$0xff] %v3731_v26  ;;  %v3618_v27 = vadd.f32 %v4845_v0, %v6026_v23  ;;  %v3609_v21 = vpop.f32.mrb[77].mxu0 }
 0x419   : > { %3761 = vst [vmem:[%s6037_s20 + $0x48] sm:$0xff] %v3729_v50  ;;  %v3610_v35 = vadd.f32 %v6026_v23, %v3609_v21  ;;  %v4846_v58 = vpop.f32.mrb[78].mxu0  ;;  %v5257_v21 = vld [vmem:[%s5340_s12 + $0xd0] sm:$0xff] }
 0x41a   : > { %v3702_v32 = vadd.f32 %v5245_v25, %v3618_v27  ;;  %v3621_v5 = vadd.f32 %v4846_v58, %v6026_v23  ;;  %v3612_v1 = vpop.f32.mrb[79].mxu0 }
 0x41b   : > { %v3700_v45 = vadd.f32 %v5246_v30, %v3610_v35  ;;  %v3613_v31 = vadd.f32 %v6026_v23, %v3612_v1 }
 0x41c   : > { %v3734_v38 = vmax.f32 %v3702_v32, 0.0  ;;  %v3703_v62 = vadd.f32 %v5247_v60, %v3621_v5  ;;  %v5258_v32 = vld [vmem:[%s5340_s12 + $0xc0] sm:$0xff]  ;;  %v5260_v60 = vld [vmem:[%s5340_s12 + $0xc8] sm:$0xff] }
 0x41d   : > { %v3732_v6 = vmax.f32 %v3700_v45, 0.0  ;;  %v3701_v33 = vadd.f32 %v5248_v42, %v3613_v31  ;;  %v5259_v45 = vld [vmem:[%s5340_s12 + $0xd8] sm:$0xff] }
 0x41e   : > { %3766 = vst [vmem:[%s6037_s20 + $0x70] sm:$0xff] %v3734_v38  ;;  %v3735_v44 = vmax.f32 %v3703_v62, 0.0 }
 0x41f   : > { %3764 = vst [vmem:[%s6037_s20 + $0x60] sm:$0xff] %v3732_v6  ;;  %v3733_v7 = vmax.f32 %v3701_v33, 0.0  ;;  %v4849_v46 = vpop.f32.mrb[80].mxu0 }
 0x420   : > { %3767 = vst [vmem:[%s6037_s20 + $0x78] sm:$0xff] %v3735_v44  ;;  %v3634_v29 = vadd.f32 %v4849_v46, %v6026_v23  ;;  %v3625_v3 = vpop.f32.mrb[81].mxu0 }
 0x421   : > { %3765 = vst [vmem:[%s6037_s20 + $0x68] sm:$0xff] %v3733_v7  ;;  %v3626_v49 = vadd.f32 %v6026_v23, %v3625_v3  ;;  %v4850_v8 = vpop.f32.mrb[82].mxu0  ;;  %v5261_v3 = vld [vmem:[%s5340_s12 + $0xf0] sm:$0xff] }
 0x422   : > { %v3706_v53 = vadd.f32 %v5249_v36, %v3634_v29  ;;  %v3637_v34 = vadd.f32 %v4850_v8, %v6026_v23  ;;  %v3628_v51 = vpop.f32.mrb[83].mxu0 }
 0x423   : > { %v3704_v52 = vadd.f32 %v5250_v9, %v3626_v49  ;;  %v3629_v15 = vadd.f32 %v6026_v23, %v3628_v51 }
 0x424   : > { %v3738_v43 = vmax.f32 %v3706_v53, 0.0  ;;  %v3707_v11 = vadd.f32 %v5251_v55, %v3637_v34  ;;  %v5262_v53 = vld [vmem:[%s5340_s12 + $0xe0] sm:$0xff]  ;;  %v5264_v55 = vld [vmem:[%s5340_s12 + $0xe8] sm:$0xff] }
 0x425   : > { %v3736_v12 = vmax.f32 %v3704_v52, 0.0  ;;  %v3705_v56 = vadd.f32 %v5252_v61, %v3629_v15  ;;  %v5263_v52 = vld [vmem:[%s5340_s12 + $0xf8] sm:$0xff] }
 0x426   : > { %3770 = vst [vmem:[%s6037_s20 + $0x90] sm:$0xff] %v3738_v43  ;;  %v3739_v57 = vmax.f32 %v3707_v11, 0.0 }
 0x427   : > { %3768 = vst [vmem:[%s6037_s20 + $0x80] sm:$0xff] %v3736_v12  ;;  %v3737_v14 = vmax.f32 %v3705_v56, 0.0  ;;  %v4853_v10 = vpop.f32.mrb[84].mxu0 }
 0x428   : > { %3771 = vst [vmem:[%s6037_s20 + $0x98] sm:$0xff] %v3739_v57  ;;  %v3650_v20 = vadd.f32 %v4853_v10, %v6026_v23  ;;  %v3641_v16 = vpop.f32.mrb[85].mxu0 }
 0x429   : > { %3769 = vst [vmem:[%s6037_s20 + $0x88] sm:$0xff] %v3737_v14  ;;  %v3642_v40 = vadd.f32 %v6026_v23, %v3641_v16  ;;  %v4854_v22 = vpop.f32.mrb[86].mxu0 }
 0x42a   : > { %v3710_v18 = vadd.f32 %v5253_v17, %v3650_v20  ;;  %v3653_v63 = vadd.f32 %v4854_v22, %v6026_v23  ;;  %v3644_v19 = vpop.f32.mrb[87].mxu0 }
 0x42b   : > { %v3708_v37 = vadd.f32 %v5254_v24, %v3642_v40  ;;  %v3645_v47 = vadd.f32 %v6026_v23, %v3644_v19 }
 0x42c   : > { %v3742_v54 = vmax.f32 %v3710_v18, 0.0  ;;  %v3711_v2 = vadd.f32 %v5255_v59, %v3653_v63 }
 0x42d   : > { %v3740_v39 = vmax.f32 %v3708_v37, 0.0  ;;  %v3709_v13 = vadd.f32 %v5256_v28, %v3645_v47 }
 0x42e   : > { %3774 = vst [vmem:[%s6037_s20 + $0xb0] sm:$0xff] %v3742_v54  ;;  %v3743_v4 = vmax.f32 %v3711_v2, 0.0 }
 0x42f   : > { %3772 = vst [vmem:[%s6037_s20 + $0xa0] sm:$0xff] %v3740_v39  ;;  %v3741_v41 = vmax.f32 %v3709_v13, 0.0  ;;  %v4857_v48 = vpop.f32.mrb[88].mxu0 }
 0x430   : > { %3775 = vst [vmem:[%s6037_s20 + $0xb8] sm:$0xff] %v3743_v4  ;;  %v3666_v26 = vadd.f32 %v4857_v48, %v6026_v23  ;;  %v3657_v50 = vpop.f32.mrb[89].mxu0 }
 0x431   : > { %3773 = vst [vmem:[%s6037_s20 + $0xa8] sm:$0xff] %v3741_v41  ;;  %v3658_v0 = vadd.f32 %v6026_v23, %v3657_v50  ;;  %v4858_v27 = vpop.f32.mrb[90].mxu0 }
 0x432   : > { %v3714_v35 = vadd.f32 %v5257_v21, %v3666_v26  ;;  %v3669_v58 = vadd.f32 %v4858_v27, %v6026_v23  ;;  %v3660_v25 = vpop.f32.mrb[91].mxu0 }
 0x433   : > { %v3712_v5 = vadd.f32 %v5258_v32, %v3658_v0  ;;  %v3661_v1 = vadd.f32 %v6026_v23, %v3660_v25 }
 0x434   : > { %v3746_v30 = vmax.f32 %v3714_v35, 0.0  ;;  %v3715_v31 = vadd.f32 %v5259_v45, %v3669_v58 }
 0x435   : > { %v3744_v38 = vmax.f32 %v3712_v5, 0.0  ;;  %v3713_v62 = vadd.f32 %v5260_v60, %v3661_v1 }
 0x436   : > { %3778 = vst [vmem:[%s6037_s20 + $0xd0] sm:$0xff] %v3746_v30  ;;  %v3747_v6 = vmax.f32 %v3715_v31, 0.0 }
 0x437   : > { %3776 = vst [vmem:[%s6037_s20 + $0xc0] sm:$0xff] %v3744_v38  ;;  %v3745_v42 = vmax.f32 %v3713_v62, 0.0  ;;  %v4861_v33 = vpop.f32.mrb[92].mxu0 }
 0x438   : > { %3779 = vst [vmem:[%s6037_s20 + $0xd8] sm:$0xff] %v3747_v6  ;;  %v3682_v44 = vadd.f32 %v4861_v33, %v6026_v23  ;;  %v3673_v7 = vpop.f32.mrb[93].mxu0 }
 0x439   : > { %3777 = vst [vmem:[%s6037_s20 + $0xc8] sm:$0xff] %v3745_v42  ;;  %v3674_v46 = vadd.f32 %v6026_v23, %v3673_v7  ;;  %v4862_v29 = vpop.f32.mrb[94].mxu0 }
 0x43a   : > { %v3718_v49 = vadd.f32 %v5261_v3, %v3682_v44  ;;  %v3685_v8 = vadd.f32 %v4862_v29, %v6026_v23  ;;  %v3676_v36 = vpop.f32.mrb[95].mxu0 }
 0x43b   : > { %v3716_v34 = vadd.f32 %v5262_v53, %v3674_v46  ;;  %v3677_v51 = vadd.f32 %v6026_v23, %v3676_v36 }
 0x43c   : > { %v3750_v9 = vmax.f32 %v3718_v49, 0.0  ;;  %v3719_v15 = vadd.f32 %v5263_v52, %v3685_v8 }
 0x43d   : > { %v3748_v43 = vmax.f32 %v3716_v34, 0.0  ;;  %v3717_v11 = vadd.f32 %v5264_v55, %v3677_v51 }
 0x43e   : > { %3782 = vst [vmem:[%s6037_s20 + $0xf0] sm:$0xff] %v3750_v9  ;;  %v3751_v12 = vmax.f32 %v3719_v15, 0.0 }
 0x43f   : > { %3780 = vst [vmem:[%s6037_s20 + $0xe0] sm:$0xff] %v3748_v43  ;;  %v3749_v61 = vmax.f32 %v3717_v11, 0.0 }
 0x440   : > { %3783 = vst [vmem:[%s6037_s20 + $0xf8] sm:$0xff] %v3751_v12 }
 0x441   : > { %3781 = vst [vmem:[%s6037_s20 + $0xe8] sm:$0xff] %v3749_v61 }
 0x442 PF: > { %s17_s24 = sadd.s32 1, %s5271_s24  }
 0x443   : > { %p14_p4 = scmp.ge.s32.totalorder %s17_s24, 4  }
 0x445   :  { %16 = sbr.rel (!%p14_p4) target bundleno = 1 (0x1), region = 88 }

</bundles_post_ra>
